<compile_context>
chip_gen: v6e
topology: v6e:2x2x1
jax: 0.10.0
libtpu: 0.0.40
codegen_flags: <defaults>
</compile_context>

<pallas_src>
import jax
import jax.numpy as jnp
from jax.experimental import pallas as pl
from jax.experimental.pallas import tpu as pltpu

# ----- hyper-params implied by the module (small, deterministic) -----
NB_CLASSES = 8      # opts.nb_of_classes
FEATURE_SIZE = 24   # opts.feature_size
HIDDEN = 512
BATCH = 8
IN_DIM = NB_CLASSES + FEATURE_SIZE  # 32


def _leaky_relu(x, slope=0.2):
    return jnp.where(x > 0, x, slope * x)


def disc_kernel(labels_ref, img_ref, emb_ref,
                w1a_ref, w1b_ref, b1_ref,
                w2_ref, b2_ref,
                w3_ref, b3_ref,
                w4_ref, b4_ref,
                out_ref):
    """Embedding lookup + 4-layer MLP, all on VMEM-resident blocks."""
    f32, bf16 = jnp.float32, jnp.bfloat16
    B = out_ref.shape[0]

    # ---- Fused embedding lookup: gather == one-hot matmul for a tiny table ----
    labels = labels_ref[...]                                               # [B, 1] int32
    class_ids = jax.lax.broadcasted_iota(jnp.int32, (B, NB_CLASSES), 1)    # [B, NB]
    onehot = (labels == class_ids).astype(f32)                             # [B, NB]
    emb_rows = jnp.dot(onehot, emb_ref[...],
                       preferred_element_type=f32)                         # [B, NB] exact

    # ---- Layer 1: cat([img, emb]) @ W1 == img @ W1a + emb @ W1b ----
    h = (jnp.dot(img_ref[...].astype(bf16), w1a_ref[...],
                 preferred_element_type=f32)
         + jnp.dot(emb_rows.astype(bf16), w1b_ref[...],
                   preferred_element_type=f32)
         + b1_ref[...])                                                    # [B, 512] f32
    h = _leaky_relu(h)

    # ---- Layer 2 (Dropout(0.4) -> identity at inference) ----
    h = jnp.dot(h.astype(bf16), w2_ref[...],
                preferred_element_type=f32) + b2_ref[...]
    h = _leaky_relu(h)

    # ---- Layer 3 (Dropout(0.4) -> identity at inference) ----
    h = jnp.dot(h.astype(bf16), w3_ref[...],
                preferred_element_type=f32) + b3_ref[...]
    h = _leaky_relu(h)

    # ---- Layer 4 (N=1): VPU multiply + lane reduction, skip the MXU ----
    out_ref[...] = (jnp.sum(h * w4_ref[...], axis=-1, keepdims=True)
                    + b4_ref[...]).astype(out_ref.dtype)                   # [B, 1]


def discriminator_forward(img, labels, params):
    """img: [B, FEATURE_SIZE] f32, labels: [B] int32 -> validity [B, 1] f32."""
    B = img.shape[0]
    labels2d = labels.reshape(B, 1).astype(jnp.int32)

    operands = (
        labels2d, img, params["emb"],
        params["w1a"], params["w1b"], params["b1"],
        params["w2"], params["b2"],
        params["w3"], params["b3"],
        params["w4"], params["b4"],
    )

    def full_spec(shape):
        return pl.BlockSpec(shape, lambda: (0,) * len(shape))

    return pl.pallas_call(
        disc_kernel,
        out_shape=jax.ShapeDtypeStruct((B, 1), jnp.float32),
        grid=(),  # single program; whole problem (~1.1 MB of weights) fits in VMEM
        in_specs=[full_spec(op.shape) for op in operands],
        out_specs=full_spec((B, 1)),
        compiler_params=pltpu.CompilerParams(),
    )(*operands)


def init_params(key):
    """Deterministic synthetic init matching the PyTorch layer shapes.

    Linear weights are stored transposed relative to PyTorch ([in, out]) so the
    kernel can do x @ W directly. W1 is stored split into the img / embedding
    row-blocks (w1a: rows 0..23, w1b: rows 24..31). Matmul weights are bf16
    (accumulation stays f32 in the kernel); biases, emb table, w4 are f32.
    """
    ks = jax.random.split(key, 9)

    def lin(kw, fan_in, fan_out, dtype):
        bound = 1.0 / jnp.sqrt(fan_in)
        w = jax.random.uniform(kw, (fan_in, fan_out), jnp.float32, -bound, bound)
        return w.astype(dtype)

    w1 = lin(ks[1], IN_DIM, HIDDEN, jnp.bfloat16)
    return {
        "emb": jax.random.normal(ks[0], (NB_CLASSES, NB_CLASSES), jnp.float32),
        "w1a": w1[:FEATURE_SIZE, :],                    # [24, 512] bf16
        "w1b": w1[FEATURE_SIZE:, :],                    # [ 8, 512] bf16
        "b1": jax.random.normal(ks[2], (1, HIDDEN), jnp.float32) * 0.01,
        "w2": lin(ks[3], HIDDEN, HIDDEN, jnp.bfloat16),
        "b2": jax.random.normal(ks[4], (1, HIDDEN), jnp.float32) * 0.01,
        "w3": lin(ks[5], HIDDEN, HIDDEN, jnp.bfloat16),
        "b3": jax.random.normal(ks[6], (1, HIDDEN), jnp.float32) * 0.01,
        # Final layer kept as a [1, 512] f32 row vector for the VPU path.
        "w4": lin(ks[7], HIDDEN, 1, jnp.float32).reshape(1, HIDDEN),
        "b4": jax.random.normal(ks[8], (1, 1), jnp.float32) * 0.01,
    }


def reference_forward(img, labels, p):
    """Pure-JAX reference with the same bf16-weight / f32-accumulate numerics."""
    f32, bf16 = jnp.float32, jnp.bfloat16
    emb = jnp.take(p["emb"], labels, axis=0)                    # [B, NB]
    d_in = jnp.concatenate([img, emb], axis=-1)                 # [B, 32]
    w1 = jnp.concatenate([p["w1a"], p["w1b"]], axis=0)          # [32, 512] bf16
    h = _leaky_relu(jnp.dot(d_in.astype(bf16), w1, preferred_element_type=f32)
                    + p["b1"])
    h = _leaky_relu(jnp.dot(h.astype(bf16), p["w2"], preferred_element_type=f32)
                    + p["b2"])
    h = _leaky_relu(jnp.dot(h.astype(bf16), p["w3"], preferred_element_type=f32)
                    + p["b3"])
    return jnp.sum(h * p["w4"], axis=-1, keepdims=True) + p["b4"]


if __name__ == "__main__":
    key = jax.random.PRNGKey(0)
    k_img, k_lab, k_par = jax.random.split(key, 3)

    img = jax.random.normal(k_img, (BATCH, FEATURE_SIZE), jnp.float32)
    labels = jax.random.randint(k_lab, (BATCH,), 0, NB_CLASSES, dtype=jnp.int32)
    params = init_params(k_par)

    validity = discriminator_forward(img, labels, params)
    validity = jax.block_until_ready(validity)

    ref = reference_forward(img, labels, params)
    assert validity.shape == (BATCH, 1)
    assert jnp.allclose(validity, ref, atol=1e-2, rtol=1e-2), (
        float(jnp.max(jnp.abs(validity - ref))))

    print("KERNEL_OK")
</pallas_src>

<mosaic_0001>
module attributes {stable_mosaic.version = 11 : i64} {
  func.func @disc_kernel(%arg0: memref<8x1xi32, #tpu.memory_space<vmem>>, %arg1: memref<8x24xf32, #tpu.memory_space<vmem>>, %arg2: memref<8x8xf32, #tpu.memory_space<vmem>>, %arg3: memref<24x512xbf16, #tpu.memory_space<vmem>>, %arg4: memref<8x512xbf16, #tpu.memory_space<vmem>>, %arg5: memref<1x512xf32, #tpu.memory_space<vmem>>, %arg6: memref<512x512xbf16, #tpu.memory_space<vmem>>, %arg7: memref<1x512xf32, #tpu.memory_space<vmem>>, %arg8: memref<512x512xbf16, #tpu.memory_space<vmem>>, %arg9: memref<1x512xf32, #tpu.memory_space<vmem>>, %arg10: memref<1x512xf32, #tpu.memory_space<vmem>>, %arg11: memref<1x1xf32, #tpu.memory_space<vmem>>, %arg12: memref<8x1xf32, #tpu.memory_space<vmem>>) attributes {dimension_semantics = [], scalar_prefetch = 0 : i64, scratch_operands = 0 : i64, tpu.core_type = #tpu.core_type<tc>} {
    %c0 = arith.constant 0 : index
    %c0_0 = arith.constant 0 : index
    %0 = vector.load %arg0[%c0, %c0_0] : memref<8x1xi32, #tpu.memory_space<vmem>>, vector<8x1xi32>
    %1 = tpu.iota {dimensions = array<i32: 1>} : vector<8x8xi32>
    %2 = vector.broadcast %0 : vector<8x1xi32> to vector<8x8xi32>
    %3 = arith.cmpi eq, %2, %1 : vector<8x8xi32>
    %4 = arith.extui %3 : vector<8x8xi1> to vector<8x8xi32>
    %5 = arith.sitofp %4 : vector<8x8xi32> to vector<8x8xf32>
    %c0_1 = arith.constant 0 : index
    %c0_2 = arith.constant 0 : index
    %6 = vector.load %arg2[%c0_1, %c0_2] : memref<8x8xf32, #tpu.memory_space<vmem>>, vector<8x8xf32>
    %cst = arith.constant dense<0.000000e+00> : vector<8x8xf32>
    %7 = tpu.matmul %5, %6, %cst {dimension_numbers = #tpu.dot_dimension_numbers<[1], [0], [0], [1], [0, 0, 1, 1], [], []>} : vector<8x8xf32>, vector<8x8xf32>, vector<8x8xf32> -> vector<8x8xf32>
    %c0_3 = arith.constant 0 : index
    %c0_4 = arith.constant 0 : index
    %8 = vector.load %arg1[%c0_3, %c0_4] : memref<8x24xf32, #tpu.memory_space<vmem>>, vector<8x24xf32>
    %9 = arith.truncf %8 : vector<8x24xf32> to vector<8x24xbf16>
    %c0_5 = arith.constant 0 : index
    %c0_6 = arith.constant 0 : index
    %10 = vector.load %arg3[%c0_5, %c0_6] : memref<24x512xbf16, #tpu.memory_space<vmem>>, vector<24x512xbf16>
    %cst_7 = arith.constant dense<0.000000e+00> : vector<8x512xf32>
    %11 = tpu.matmul %9, %10, %cst_7 {dimension_numbers = #tpu.dot_dimension_numbers<[1], [0], [0], [1], [0, 0, 1, 1], [], []>} : vector<8x24xbf16>, vector<24x512xbf16>, vector<8x512xf32> -> vector<8x512xf32>
    %12 = arith.truncf %7 : vector<8x8xf32> to vector<8x8xbf16>
    %c0_8 = arith.constant 0 : index
    %c0_9 = arith.constant 0 : index
    %13 = vector.load %arg4[%c0_8, %c0_9] : memref<8x512xbf16, #tpu.memory_space<vmem>>, vector<8x512xbf16>
    %cst_10 = arith.constant dense<0.000000e+00> : vector<8x512xf32>
    %14 = tpu.matmul %12, %13, %cst_10 {dimension_numbers = #tpu.dot_dimension_numbers<[1], [0], [0], [1], [0, 0, 1, 1], [], []>} : vector<8x8xbf16>, vector<8x512xbf16>, vector<8x512xf32> -> vector<8x512xf32>
    %15 = arith.addf %11, %14 : vector<8x512xf32>
    %c0_11 = arith.constant 0 : index
    %c0_12 = arith.constant 0 : index
    %16 = vector.load %arg5[%c0_11, %c0_12] : memref<1x512xf32, #tpu.memory_space<vmem>>, vector<1x512xf32>
    %17 = vector.broadcast %16 : vector<1x512xf32> to vector<8x512xf32>
    %18 = arith.addf %15, %17 : vector<8x512xf32>
    %cst_13 = arith.constant 0.000000e+00 : f32
    %19 = vector.broadcast %cst_13 : f32 to vector<8x512xf32>
    %20 = arith.cmpf ogt, %18, %19 : vector<8x512xf32>
    %cst_14 = arith.constant 2.000000e-01 : f32
    %21 = vector.broadcast %cst_14 : f32 to vector<8x512xf32>
    %22 = arith.mulf %21, %18 : vector<8x512xf32>
    %23 = arith.select %20, %18, %22 : vector<8x512xi1>, vector<8x512xf32>
    %24 = arith.truncf %23 : vector<8x512xf32> to vector<8x512xbf16>
    %c0_15 = arith.constant 0 : index
    %c0_16 = arith.constant 0 : index
    %25 = vector.load %arg6[%c0_15, %c0_16] : memref<512x512xbf16, #tpu.memory_space<vmem>>, vector<512x512xbf16>
    %cst_17 = arith.constant dense<0.000000e+00> : vector<8x512xf32>
    %26 = tpu.matmul %24, %25, %cst_17 {dimension_numbers = #tpu.dot_dimension_numbers<[1], [0], [0], [1], [0, 0, 1, 1], [], []>} : vector<8x512xbf16>, vector<512x512xbf16>, vector<8x512xf32> -> vector<8x512xf32>
    %c0_18 = arith.constant 0 : index
    %c0_19 = arith.constant 0 : index
    %27 = vector.load %arg7[%c0_18, %c0_19] : memref<1x512xf32, #tpu.memory_space<vmem>>, vector<1x512xf32>
    %28 = vector.broadcast %27 : vector<1x512xf32> to vector<8x512xf32>
    %29 = arith.addf %26, %28 : vector<8x512xf32>
    %cst_20 = arith.constant 0.000000e+00 : f32
    %30 = vector.broadcast %cst_20 : f32 to vector<8x512xf32>
    %31 = arith.cmpf ogt, %29, %30 : vector<8x512xf32>
    %cst_21 = arith.constant 2.000000e-01 : f32
    %32 = vector.broadcast %cst_21 : f32 to vector<8x512xf32>
    %33 = arith.mulf %32, %29 : vector<8x512xf32>
    %34 = arith.select %31, %29, %33 : vector<8x512xi1>, vector<8x512xf32>
    %35 = arith.truncf %34 : vector<8x512xf32> to vector<8x512xbf16>
    %c0_22 = arith.constant 0 : index
    %c0_23 = arith.constant 0 : index
    %36 = vector.load %arg8[%c0_22, %c0_23] : memref<512x512xbf16, #tpu.memory_space<vmem>>, vector<512x512xbf16>
    %cst_24 = arith.constant dense<0.000000e+00> : vector<8x512xf32>
    %37 = tpu.matmul %35, %36, %cst_24 {dimension_numbers = #tpu.dot_dimension_numbers<[1], [0], [0], [1], [0, 0, 1, 1], [], []>} : vector<8x512xbf16>, vector<512x512xbf16>, vector<8x512xf32> -> vector<8x512xf32>
    %c0_25 = arith.constant 0 : index
    %c0_26 = arith.constant 0 : index
    %38 = vector.load %arg9[%c0_25, %c0_26] : memref<1x512xf32, #tpu.memory_space<vmem>>, vector<1x512xf32>
    %39 = vector.broadcast %38 : vector<1x512xf32> to vector<8x512xf32>
    %40 = arith.addf %37, %39 : vector<8x512xf32>
    %cst_27 = arith.constant 0.000000e+00 : f32
    %41 = vector.broadcast %cst_27 : f32 to vector<8x512xf32>
    %42 = arith.cmpf ogt, %40, %41 : vector<8x512xf32>
    %cst_28 = arith.constant 2.000000e-01 : f32
    %43 = vector.broadcast %cst_28 : f32 to vector<8x512xf32>
    %44 = arith.mulf %43, %40 : vector<8x512xf32>
    %45 = arith.select %42, %40, %44 : vector<8x512xi1>, vector<8x512xf32>
    %c0_29 = arith.constant 0 : index
    %c0_30 = arith.constant 0 : index
    %46 = vector.load %arg10[%c0_29, %c0_30] : memref<1x512xf32, #tpu.memory_space<vmem>>, vector<1x512xf32>
    %47 = vector.broadcast %46 : vector<1x512xf32> to vector<8x512xf32>
    %48 = arith.mulf %45, %47 : vector<8x512xf32>
    %cst_31 = arith.constant dense<0.000000e+00> : vector<8xf32>
    %49 = vector.multi_reduction <add>, %48, %cst_31 [1] : vector<8x512xf32> to vector<8xf32>
    %50 = vector.shape_cast %49 : vector<8xf32> to vector<8x1xf32>
    %c0_32 = arith.constant 0 : index
    %c0_33 = arith.constant 0 : index
    %51 = vector.load %arg11[%c0_32, %c0_33] : memref<1x1xf32, #tpu.memory_space<vmem>>, vector<1x1xf32>
    %52 = vector.broadcast %51 : vector<1x1xf32> to vector<8x1xf32>
    %53 = arith.addf %50, %52 : vector<8x1xf32>
    %c0_34 = arith.constant 0 : index
    %c0_35 = arith.constant 0 : index
    %54 = vector.load %arg12[%c0_34, %c0_35] : memref<8x1xf32, #tpu.memory_space<vmem>>, vector<8x1xf32>
    tpu.vector_store %arg12[%c0_34, %c0_35], %53 {strides = array<i32>} : memref<8x1xf32, #tpu.memory_space<vmem>>, vector<8x1xf32>,
    return
  }
}

</mosaic_0001>

<bundles_post_ra>
// kernel: tpu_custom_call.1
= control target key start
LH: loop header
LB: loop body
LE: loop exit
PB: predicated region body
PF: predicated region fallthrough
CT: control target
= control target key end

     0   :  { %s3488_s0 = inlined_call_operand.vmem [shape: s32[8,1], index: 0, kind: input, shape index: {}]   ;;  %s3489_s1 = inlined_call_operand.hbm [shape: f32[8,24], index: 1, kind: input, shape index: {}]   ;;  %s3490_s2 = inlined_call_operand.hbm [shape: f32[8,8], index: 2, kind: input, shape index: {}]   ;;  %s3491_s3 = inlined_call_operand.hbm [shape: bf16[24,512], index: 3, kind: input, shape index: {}]   ;;  %s3492_s4 = inlined_call_operand.vmem [shape: bf16[8,512], index: 4, kind: input, shape index: {}]   ;;  %s3493_s5 = inlined_call_operand.vmem [shape: f32[1,512], index: 5, kind: input, shape index: {}]   ;;  %s3494_s6 = inlined_call_operand.hbm [shape: bf16[512,512], index: 6, kind: input, shape index: {}]   ;;  %s3495_s7 = inlined_call_operand.hbm [shape: f32[1,512], index: 7, kind: input, shape index: {}]   ;;  %s3496_s8 = inlined_call_operand.hbm [shape: bf16[512,512], index: 8, kind: input, shape index: {}]   ;;  %s3497_s9 = inlined_call_operand.vmem [shape: f32[1,512], index: 9, kind: input, shape index: {}]   ;;  %s3498_s10 = inlined_call_operand.vmem [shape: f32[1,512], index: 10, kind: input, shape index: {}]   ;;  %s3499_s11 = inlined_call_operand.<no memory space> [shape: f32[1,1], index: 11, kind: input, shape index: {}]   ;;  %s3500_s12 = inlined_call_operand.vmem [shape: f32[8,1], index: 12, kind: output, shape index: {}]  }
   0x1   :  { %v17_v0 = vstv %s3499_s11 }
   0x2   :  { %18 = vst [vmem:[#allocation2] sm:$0x1] %v17_v0 }
   0x3   :  { %19 = vsyncpa [#allocation4], 0 }
   0x4   :  { %20 = vsyncpa [#allocation6], 0 }
   0x5   :  { %21 = vsyncpa [#allocation9], 0 }
   0x6   :  { %22 = vsyncpa [#allocation12], 0  ;;  %s3302_s23 = smov [#allocation5]  }
   0x7   :  { %s41_s24 = sshll.u32 %s3302_s23, 4  ;;  %s42_s24 = int_to_ptr.vmem [resolvable:$true] %s41_s24 }
   0x8   :  { %s3182_s25 = scalar_lea.vmem %s42_s24, 128  ;;  %p3187_p1 = scmp.lt.s32.totalorder %s42_s24, %s42_s24 }
   0x9   :  { %p3183_p0 = scmp.ne.s32.totalorder %s42_s24, %s3182_s25  ;;  %p3188_p2 = scmp.lt.s32.totalorder %s3182_s25, %s3182_s25 }
   0xb   :  { %p3189_p3 = por %p3188_p2, %p3187_p1 }
   0xd   :  { %p3190_p4 = pnand %p3189_p3, %p3183_p0 }
   0xf   :  { %3193 = shalt.err (!%p3190_p4)
}
  0x10   :  { %44 = dma.hbm_to_vmem [thread:$0]  %s3490_s2, 128, %s42_s24, [#allocation6]  }
  0x11   :  { %s3303_s11 = smov [#allocation8]   ;;  %s3304_s29 = smov [#allocation3]  }
  0x12   :  { %s66_s28 = sshll.u32 %s3303_s11, 4  ;;  %s31_s30 = sshll.u32 %s3304_s29, 4  ;;  %s67_s28 = int_to_ptr.vmem [resolvable:$true] %s66_s28  ;;  %s32_s30 = int_to_ptr.vmem [resolvable:$true] %s31_s30 }
  0x13   :  { %s3202_s13 = scalar_lea.vmem %s67_s28, 16384  ;;  %p3207_p6 = scmp.lt.s32.totalorder %s67_s28, %s67_s28 }
  0x14   :  { %p3203_p5 = scmp.ne.s32.totalorder %s67_s28, %s3202_s13  ;;  %p3208_p7 = scmp.lt.s32.totalorder %s3202_s13, %s3202_s13 }
  0x16   :  { %p3209_p8 = por %p3208_p7, %p3207_p6 }
  0x18   :  { %p3210_p9 = pnand %p3209_p8, %p3203_p5 }
  0x1a   :  { %3213 = shalt.err (!%p3210_p9)
}
  0x1b   :  { %s3305_s14 = smov 256   ;;  %s3306_s15 = smov 16  }
  0x1c   :  { %72 = dma.hbm_to_vmem [thread:$0]  %s3494_s6, 16384, %s67_s28, [#allocation9], %s3305_s14, %s3305_s14, %s3306_s15  }
  0x1d   :  { %s3222_s2 = scalar_lea.vmem %s32_s30, 128  ;;  %p3227_p11 = scmp.lt.s32.totalorder %s32_s30, %s32_s30 }
  0x1e   :  { %p3223_p10 = scmp.ne.s32.totalorder %s32_s30, %s3222_s2  ;;  %p3228_p12 = scmp.lt.s32.totalorder %s3222_s2, %s3222_s2 }
  0x20   :  { %p3229_p13 = por %p3228_p12, %p3227_p11 }
  0x22   :  { %p3230_p0 = pnand %p3229_p13, %p3223_p10 }
  0x24   :  { %3233 = shalt.err (!%p3230_p0)
}
  0x25   :  { %34 = dma.hbm_to_vmem [thread:$0]  %s3489_s1, 128, %s32_s30, [#allocation4]  }
  0x26   :  { %s3307_s20 = smov [#allocation7]   ;;  %s3308_s22 = smov [#allocation10]  }
  0x27   :  { %s50_s21 = sshll.u32 %s3307_s20, 4  ;;  %s79_s23 = sshll.u32 %s3308_s22, 4  ;;  %s51_s21 = int_to_ptr.vmem [resolvable:$true] %s50_s21  ;;  %s80_s23 = int_to_ptr.vmem [resolvable:$true] %s79_s23 }
  0x28   :  { %s3242_s24 = scalar_lea.vmem %s51_s21, 768  ;;  %p3247_p2 = scmp.lt.s32.totalorder %s51_s21, %s51_s21 }
  0x29   :  { %p3243_p1 = scmp.ne.s32.totalorder %s51_s21, %s3242_s24  ;;  %p3248_p3 = scmp.lt.s32.totalorder %s3242_s24, %s3242_s24 }
  0x2b   :  { %p3249_p4 = por %p3248_p3, %p3247_p2 }
  0x2d   :  { %p3250_p5 = pnand %p3249_p4, %p3243_p1 }
  0x2f   :  { %3253 = shalt.err (!%p3250_p5)
}
  0x30   :  { %56 = dma.hbm_to_vmem [thread:$0]  %s3491_s3, 768, %s51_s21, [#allocation6], %s3305_s14, %s3305_s14, %s3306_s15  }
  0x31   :  { %s3262_s1 = scalar_lea.vmem %s80_s23, 64  ;;  %p3267_p7 = scmp.lt.s32.totalorder %s80_s23, %s80_s23 }
  0x32   :  { %p3263_p6 = scmp.ne.s32.totalorder %s80_s23, %s3262_s1  ;;  %p3268_p8 = scmp.lt.s32.totalorder %s3262_s1, %s3262_s1 }
  0x34   :  { %p3269_p9 = por %p3268_p8, %p3267_p7 }
  0x36   :  { %p3270_p10 = pnand %p3269_p9, %p3263_p6 }
  0x38   :  { %3273 = shalt.err (!%p3270_p10)
}
  0x39   :  { %82 = dma.hbm_to_vmem [thread:$0]  %s3495_s7, 64, %s80_s23, [#allocation9]  }
  0x3a   :  { %s3309_s11 = smov [#allocation11]  }
  0x3b   :  { %s88_s28 = sshll.u32 %s3309_s11, 4  ;;  %s89_s28 = int_to_ptr.vmem [resolvable:$true] %s88_s28 }
  0x3c   :  { %s3282_s29 = scalar_lea.vmem %s89_s28, 16384  ;;  %p3287_p12 = scmp.lt.s32.totalorder %s89_s28, %s89_s28 }
  0x3d   :  { %p3283_p11 = scmp.ne.s32.totalorder %s89_s28, %s3282_s29  ;;  %p3288_p13 = scmp.lt.s32.totalorder %s3282_s29, %s3282_s29 }
  0x3f   :  { %p3289_p0 = por %p3288_p13, %p3287_p12 }
  0x41   :  { %p3290_p1 = pnand %p3289_p0, %p3283_p11 }
  0x43   :  { %3293 = shalt.err (!%p3290_p1)
}
  0x44   :  { %94 = dma.hbm_to_vmem [thread:$0]  %s3496_s8, 16384, %s89_s28, [#allocation12], %s3305_s14, %s3305_s14, %s3306_s15  }
  0x45   :  { %3294 = dma.done.wait [#allocation4], 128  }
  0x46   :  { %3295 = vsyncadd [#allocation4], 4294967168 }
  0x47   :  { %3296 = dma.done.wait [#allocation6], 896  }
  0x48   :  { %3297 = vsyncadd [#allocation6], 4294966400 }
  0x49   :  { %3298 = dma.done.wait [#allocation9], 16448  }
  0x4a   :  { %3299 = vsyncadd [#allocation9], 4294950848 }
  0x4b   :  { %3300 = dma.done.wait [#allocation12], 16384  }
  0x4c   :  { %3301 = vsyncadd [#allocation12], 4294950912  ;;  %v3310_v1 = vmov 0   ;;  %v3311_v2 = vmov 0.0   ;;  %vm3312_vm0 = vmmov 0   ;;  %v120_v3 = vld [vmem:[%s3488_s0] sm:$0xff]  ;;  %v121_v11 = vlaneseq }
  0x4d   :  { %2775 = vset.pattern.permute.xlu0 %v3310_v1  ;;  %2759 = vmatprep.subr.mxu0 %v3311_v2  ;;  %v129_v4 = vld [vmem:[#allocation5] sm:$0xff]  ;;  %v213_v5 = vld [vmem:[%s3492_s4] sm:$0xff]  ;;  %vm228_vm1 = vcmask 1043456   ;;  %vm130_vm2 = vcmask 64512   ;;  %v210_v17 = vld [vmem:[#allocation7 + $0x20] sm:$0xff]  ;;  %vm353_vm4 = vcmask 195584  }
  0x4e   :  { %273 = vmatprep.mubr.bf16.mxu1 %v3310_v1  ;;  %2761 = vmatprep.mubr.msk.f32.mxu0 %vm3312_vm0, %v3311_v2  ;;  %v2481_v6 = vcombine.high %v213_v5, %v213_v5  ;;  %v2480_v7 = vcombine.low %v213_v5, %v213_v5  ;;  %v214_v8 = vld [vmem:[%s3492_s4 + $0x8] sm:$0xff]  ;;  %v122_v12 = vand.u32 127, %v121_v11  ;;  %v211_v18 = vld [vmem:[#allocation7 + $0x28] sm:$0xff]  ;;  %v2493_v19 = vcombine.high %v210_v17, %v210_v17  ;;  %v2784_v30 = vld [vmem:[#allocation7] ss:$16 sps:$4 sm:$0xff]  }
  0x4f   :  { %124 = vperm.xlu0 %2775, %v120_v3   ;;  %2760 = vmatpush3.msra.mxu0 %v129_v4  ;;  %v2483_v9 = vcombine.high %v214_v8, %v214_v8  ;;  %v2482_v15 = vcombine.low %v214_v8, %v214_v8  ;;  %v2495_v20 = vcombine.high %v211_v18, %v211_v18  ;;  %v2786_v27 = vld [vmem:[#allocation7 + $0x4] ss:$16 sps:$4 sm:$0xff]   ;;  %v2789_v28 = vld [vmem:[#allocation7 + $0xc] ss:$16 sps:$4 sm:$0xff]   ;;  %v2787_v31 = vld [vmem:[#allocation7 + $0x8] ss:$16 sps:$4 sm:$0xff]  }
  0x50   :  { %2484 = vmatprep.subr.msk.bf16.mxu1 %vm228_vm1, %v2481_v6  ;;  %v230_v10 = vsel %vm228_vm1, %v2480_v7, 0  ;;  %v2492_v21 = vcombine.low %v210_v17, %v210_v17  ;;  %v2494_v22 = vcombine.low %v211_v18, %v211_v18  ;;  %v204_v32 = vld [vmem:[#allocation3] sm:$0xff] }
  0x51   :  { %256 = vmatpush1.bf16.msra.mxu1 %v230_v10  ;;  %2486 = vmatprep.subr.msk.bf16.mxu0 %vm228_vm1, %v2483_v9  ;;  %v236_v16 = vsel %vm228_vm1, %v2482_v15, 0  ;;  %v2792_v33 = vld [vmem:[#allocation8 + $0xe4] ss:$16 sps:$4 sm:$0xff]   ;;  %v205_v35 = vpack.c.bf16 %v204_v32, %v204_v32  ;;  %v2790_v36 = vld [vmem:[#allocation8 + $0xe0] ss:$16 sps:$4 sm:$0xff]  }
  0x52   :  { %2496 = vmatprep.subr.msk.bf16.mxu1 %vm228_vm1, %v2493_v19  ;;  %v358_v25 = vsel %vm228_vm1, %v2492_v21, 0  ;;  %v364_v26 = vsel %vm228_vm1, %v2494_v22, 0  ;;  %v2795_v34 = vld [vmem:[#allocation8 + $0x2e4] ss:$16 sps:$4 sm:$0xff]   ;;  %v2793_v37 = vld [vmem:[#allocation8 + $0x2e0] ss:$16 sps:$4 sm:$0xff]  }
  0x53   :  { %v2798_v38 = vld [vmem:[#allocation8 + $0xc4] ss:$16 sps:$4 sm:$0xff]   ;;  %v2796_v40 = vld [vmem:[#allocation8 + $0xc0] ss:$16 sps:$4 sm:$0xff]  }
  0x54   :  { %v2801_v39 = vld [vmem:[#allocation8 + $0x2c4] ss:$16 sps:$4 sm:$0xff]   ;;  %v2799_v41 = vld [vmem:[#allocation8 + $0x2c0] ss:$16 sps:$4 sm:$0xff]  }
  0x55   :  { %v2804_v42 = vld [vmem:[#allocation8 + $0xa4] ss:$16 sps:$4 sm:$0xff]   ;;  %v2802_v44 = vld [vmem:[#allocation8 + $0xa0] ss:$16 sps:$4 sm:$0xff]  }
  0x56   :  { %v2807_v43 = vld [vmem:[#allocation8 + $0x2a4] ss:$16 sps:$4 sm:$0xff]   ;;  %v2805_v45 = vld [vmem:[#allocation8 + $0x2a0] ss:$16 sps:$4 sm:$0xff]  }
  0x57   :  { %v2810_v46 = vld [vmem:[#allocation8 + $0x84] ss:$16 sps:$4 sm:$0xff]   ;;  %v2808_v48 = vld [vmem:[#allocation8 + $0x80] ss:$16 sps:$4 sm:$0xff]  }
  0x58   :  { %v2813_v47 = vld [vmem:[#allocation8 + $0x284] ss:$16 sps:$4 sm:$0xff]   ;;  %v2811_v49 = vld [vmem:[#allocation8 + $0x280] ss:$16 sps:$4 sm:$0xff]  }
  0x59   :  { %v2816_v50 = vld [vmem:[#allocation8 + $0x64] ss:$16 sps:$4 sm:$0xff]   ;;  %v2814_v52 = vld [vmem:[#allocation8 + $0x60] ss:$16 sps:$4 sm:$0xff]  }
  0x5a   :  { %v2819_v51 = vld [vmem:[#allocation8 + $0x264] ss:$16 sps:$4 sm:$0xff]   ;;  %v2817_v53 = vld [vmem:[#allocation8 + $0x260] ss:$16 sps:$4 sm:$0xff]  }
  0x5b   :  { %v2822_v54 = vld [vmem:[#allocation8 + $0x44] ss:$16 sps:$4 sm:$0xff]   ;;  %v2820_v56 = vld [vmem:[#allocation8 + $0x40] ss:$16 sps:$4 sm:$0xff]  }
  0x5c   :  { %v2825_v55 = vld [vmem:[#allocation8 + $0x244] ss:$16 sps:$4 sm:$0xff]   ;;  %v2823_v57 = vld [vmem:[#allocation8 + $0x240] ss:$16 sps:$4 sm:$0xff]  }
  0x5d   :  { %v2828_v58 = vld [vmem:[#allocation8 + $0x24] ss:$16 sps:$4 sm:$0xff]   ;;  %v2826_v60 = vld [vmem:[#allocation8 + $0x20] ss:$16 sps:$4 sm:$0xff]  }
  0x5e   :  { %v2831_v59 = vld [vmem:[#allocation8 + $0x224] ss:$16 sps:$4 sm:$0xff]   ;;  %v2829_v61 = vld [vmem:[#allocation8 + $0x220] ss:$16 sps:$4 sm:$0xff]  }
  0x5f   :  { %v2834_v62 = vld [vmem:[#allocation8 + $0x4] ss:$16 sps:$4 sm:$0xff]   ;;  %v2832_v0 = vld [vmem:[#allocation8] ss:$16 sps:$4 sm:$0xff]  }
  0x60   :  { %v2837_v63 = vld [vmem:[#allocation8 + $0x204] ss:$16 sps:$4 sm:$0xff]   ;;  %v2838_v4 = vld [vmem:[#allocation8 + $0x1e0] ss:$16 sps:$4 sm:$0xff]  }
  0x61   :  { %v2843_v3 = vld [vmem:[#allocation8 + $0x3e4] ss:$16 sps:$4 sm:$0xff]   ;;  %v2841_v5 = vld [vmem:[#allocation8 + $0x3e0] ss:$16 sps:$4 sm:$0xff]  }
  0x62   :  { %v2846_v6 = vld [vmem:[#allocation8 + $0x1c4] ss:$16 sps:$4 sm:$0xff]   ;;  %v2844_v8 = vld [vmem:[#allocation8 + $0x1c0] ss:$16 sps:$4 sm:$0xff]  }
  0x63   :  { %v2849_v7 = vld [vmem:[#allocation8 + $0x3c4] ss:$16 sps:$4 sm:$0xff]   ;;  %v2847_v9 = vld [vmem:[#allocation8 + $0x3c0] ss:$16 sps:$4 sm:$0xff]  }
  0x64   :  { %v2852_v10 = vld [vmem:[#allocation8 + $0x1a4] ss:$16 sps:$4 sm:$0xff]   ;;  %v2856_v17 = vld [vmem:[#allocation8 + $0x180] ss:$16 sps:$4 sm:$0xff]  }
  0x65   :  { %v2858_v15 = vld [vmem:[#allocation8 + $0x184] ss:$16 sps:$4 sm:$0xff]   ;;  %v2859_v18 = vld [vmem:[#allocation8 + $0x380] ss:$16 sps:$4 sm:$0xff]  }
  0x66   :  { %v2864_v19 = vld [vmem:[#allocation8 + $0x164] ss:$16 sps:$4 sm:$0xff]   ;;  %v2862_v21 = vld [vmem:[#allocation8 + $0x160] ss:$16 sps:$4 sm:$0xff]  }
  0x67   :  { %v2865_v22 = vld [vmem:[#allocation8 + $0x360] ss:$16 sps:$4 sm:$0xff]   ;;  %v2885_v32 = vld [vmem:[#allocation8 + $0x304] ss:$16 sps:$4 sm:$0xff]  }
  0xca   :  { %v125_v13 = vpop.permute.xlu0 %124 }
  0xcb   :  { %vm126_vm3 = vcmp.eq.s32.totalorder %v125_v13, %v122_v12  ;;  %v2855_v12 = vld [vmem:[#allocation8 + $0x3a4] ss:$16 sps:$4 sm:$0xff]   ;;  %v2850_v13 = vld [vmem:[#allocation8 + $0x1a0] ss:$16 sps:$4 sm:$0xff]  }
  0xcc   :  { %v2478_v14 = vsel %vm126_vm3, 1.0, %v3311_v2  ;;  %v2840_v2 = vld [vmem:[#allocation8 + $0x1e4] ss:$16 sps:$4 sm:$0xff]  }
  0xcd   :  { %2762 = vmatmul.mubr.msk.f32.vlgmr.msra.gmra.mxu0 %vm130_vm2, %v2478_v14  ;;  %v2853_v14 = vld [vmem:[#allocation8 + $0x3a0] ss:$16 sps:$4 sm:$0xff]  }
  0xce   :  { %314 = vmatprep.mubr.bf16.mxu0 %v3310_v1  ;;  %297 = vmatpush1.bf16.msra.mxu0 %v236_v16  ;;  %v2861_v16 = vld [vmem:[#allocation8 + $0x384] ss:$16 sps:$4 sm:$0xff]  }
  0xcf   :  { %2498 = vmatprep.subr.msk.bf16.mxu0 %vm228_vm1, %v2495_v20  ;;  %v2867_v20 = vld [vmem:[#allocation8 + $0x364] ss:$16 sps:$4 sm:$0xff]   ;;  %vm2468_vm1 = vcmask 7168  }
 0x18d   :  { %v200_v23 = vpop.f32.mrf.mxu0 }
 0x18e   :  { %v212_v24 = vpack.c.bf16 %v200_v23, %v200_v23  ;;  %v2870_v23 = vld [vmem:[#allocation8 + $0x144] ss:$16 sps:$4 sm:$0xff]  }
 0x18f   :  { %v2763_v29 = vpop.f32.mrf.mxu0 }
 0x190   :  { %2485 = vmatmul.mubr.msk.bf16.vlgmr.msra.gmra.mxu1 %vm130_vm2, %v212_v24  ;;  %2487 = vmatmul.mubr.msk.bf16.vlgmr.msra.gmra.mxu0 %vm130_vm2, %v212_v24  ;;  %v2873_v24 = vld [vmem:[#allocation8 + $0x344] ss:$16 sps:$4 sm:$0xff]   ;;  %v2874_v29 = vld [vmem:[#allocation8 + $0x120] ss:$16 sps:$4 sm:$0xff]  }
 0x191   :  { %382 = vmatpush1.bf16.msra.mxu1 %v358_v25  ;;  %423 = vmatpush1.bf16.msra.mxu0 %v364_v26  ;;  %v2868_v25 = vld [vmem:[#allocation8 + $0x140] ss:$16 sps:$4 sm:$0xff]  }
 0x192   :  { %383 = vmatprep.subr.bf16.mxu1 %v2786_v27  ;;  %424 = vmatprep.subr.bf16.mxu0 %v2789_v28  ;;  %v2871_v26 = vld [vmem:[#allocation8 + $0x340] ss:$16 sps:$4 sm:$0xff]   ;;  %v2876_v27 = vld [vmem:[#allocation8 + $0x124] ss:$16 sps:$4 sm:$0xff]  }
 0x193   :  { %401 = vmatprep.mubr.bf16.mxu1 %v3310_v1  ;;  %442 = vmatprep.mubr.bf16.mxu0 %v3310_v1  ;;  %v2835_v1 = vld [vmem:[#allocation8 + $0x200] ss:$16 sps:$4 sm:$0xff]   ;;  %v2879_v28 = vld [vmem:[#allocation8 + $0x324] ss:$16 sps:$4 sm:$0xff]  }
 0x195   :  { %384 = vmatpush1.bf16.msra.mxu1 %v2784_v30  ;;  %425 = vmatpush1.bf16.msra.mxu0 %v2787_v31  ;;  %v2877_v30 = vld [vmem:[#allocation8 + $0x320] ss:$16 sps:$4 sm:$0xff]   ;;  %v2882_v31 = vld [vmem:[#allocation8 + $0x104] ss:$16 sps:$4 sm:$0xff]  }
 0x196   :  { %1283 = vmatprep.subr.bf16.mxu1 %v2792_v33  ;;  %1324 = vmatprep.subr.bf16.mxu0 %v2795_v34  ;;  %v2880_v33 = vld [vmem:[#allocation8 + $0x100] ss:$16 sps:$4 sm:$0xff]  }
 0x197   :  { %v2883_v34 = vld [vmem:[#allocation8 + $0x300] ss:$16 sps:$4 sm:$0xff]  }
 0x198   :  { %2497 = vmatmul.mubr.msk.bf16.vlgmr.msra.gmra.mxu1 %vm353_vm4, %v205_v35  ;;  %2499 = vmatmul.mubr.msk.bf16.vlgmr.msra.gmra.mxu0 %vm353_vm4, %v205_v35  ;;  %v2888_v35 = vld [vmem:[#allocation8 + $0xec] ss:$16 sps:$4 sm:$0xff]  }
 0x199   :  { %1284 = vmatpush1.bf16.msra.mxu1 %v2790_v36  ;;  %1325 = vmatpush1.bf16.msra.mxu0 %v2793_v37  ;;  %v2891_v36 = vld [vmem:[#allocation8 + $0x2ec] ss:$16 sps:$4 sm:$0xff]   ;;  %v454_v37 = vshrl.u32 %v121_v11, 7 }
 0x19a   :  { %1285 = vmatprep.subr.bf16.mxu1 %v2798_v38  ;;  %1326 = vmatprep.subr.bf16.mxu0 %v2801_v39 }
 0x19d   :  { %1286 = vmatpush1.bf16.msra.mxu1 %v2796_v40  ;;  %1327 = vmatpush1.bf16.msra.mxu0 %v2799_v41 }
 0x19e   :  { %1287 = vmatprep.subr.bf16.mxu1 %v2804_v42  ;;  %1328 = vmatprep.subr.bf16.mxu0 %v2807_v43  ;;  %v3430_v42 = vsub.s32 0, %v454_v37  ;;  %v3432_v43 = vsub.s32 2, %v454_v37 }
 0x1a1   :  { %1288 = vmatpush1.bf16.msra.mxu1 %v2802_v44  ;;  %1329 = vmatpush1.bf16.msra.mxu0 %v2805_v45 }
 0x1a2   :  { %1289 = vmatprep.subr.bf16.mxu1 %v2810_v46  ;;  %1330 = vmatprep.subr.bf16.mxu0 %v2813_v47  ;;  %v451_v46 = vld [vmem:[%s3493_s5] sm:$0xf] }
 0x1a3   :  { %v456_v11 = vrot.slane %v451_v46, %v3430_v42 }
 0x1a5   :  { %1290 = vmatpush1.bf16.msra.mxu1 %v2808_v48  ;;  %1331 = vmatpush1.bf16.msra.mxu0 %v2811_v49  ;;  %v3437_v49 = vsub.s32 1, %v454_v37 }
 0x1a6   :  { %1291 = vmatprep.subr.bf16.mxu1 %v2816_v50  ;;  %1332 = vmatprep.subr.bf16.mxu0 %v2819_v51  ;;  %v3439_v50 = vsub.s32 3, %v454_v37  ;;  %v464_v51 = vrot.slane %v451_v46, %v3432_v43  ;;  %v2918_v37 = vld [vmem:[#allocation8 + $0x4c] ss:$16 sps:$4 sm:$0xff]  }
 0x1a9   :  { %1292 = vmatpush1.bf16.msra.mxu1 %v2814_v52  ;;  %1333 = vmatpush1.bf16.msra.mxu0 %v2817_v53 }
 0x1aa   :  { %1293 = vmatprep.subr.bf16.mxu1 %v2822_v54  ;;  %1334 = vmatprep.subr.bf16.mxu0 %v2825_v55 }
 0x1ad   :  { %1294 = vmatpush1.bf16.msra.mxu1 %v2820_v56  ;;  %1335 = vmatpush1.bf16.msra.mxu0 %v2823_v57  ;;  %v460_v57 = vrot.slane %v451_v46, %v3437_v49 }
 0x1ae   :  { %1295 = vmatprep.subr.bf16.mxu1 %v2828_v58  ;;  %1336 = vmatprep.subr.bf16.mxu0 %v2831_v59  ;;  %v468_v59 = vrot.slane %v451_v46, %v3439_v50  ;;  %v2925_v46 = vld [vmem:[#allocation8 + $0x228] ss:$16 sps:$4 sm:$0xff]  }
 0x1b1   :  { %1296 = vmatpush1.bf16.msra.mxu1 %v2826_v60  ;;  %1337 = vmatpush1.bf16.msra.mxu0 %v2829_v61 }
 0x1b2   :  { %1297 = vmatprep.subr.bf16.mxu1 %v2834_v62  ;;  %1338 = vmatprep.subr.bf16.mxu0 %v2837_v63 }
 0x1b5   :  { %1298 = vmatpush1.bf16.msra.mxu1 %v2832_v0  ;;  %1339 = vmatpush1.bf16.msra.mxu0 %v2835_v1 }
 0x1b6   :  { %1299 = vmatprep.subr.bf16.mxu1 %v2840_v2  ;;  %1340 = vmatprep.subr.bf16.mxu0 %v2843_v3 }
 0x1b9   :  { %1300 = vmatpush2.bf16.msra.mxu1 %v2838_v4  ;;  %1341 = vmatpush2.bf16.msra.mxu0 %v2841_v5 }
 0x1ba   :  { %1301 = vmatprep.subr.bf16.mxu1 %v2846_v6  ;;  %1342 = vmatprep.subr.bf16.mxu0 %v2849_v7 }
 0x1bd   :  { %1302 = vmatpush2.bf16.msra.mxu1 %v2844_v8  ;;  %1343 = vmatpush2.bf16.msra.mxu0 %v2847_v9 }
 0x1be   :  { %1303 = vmatprep.subr.bf16.mxu1 %v2852_v10  ;;  %1344 = vmatprep.subr.bf16.mxu0 %v2855_v12 }
 0x1c1   :  { %1304 = vmatpush2.bf16.msra.mxu1 %v2850_v13  ;;  %1345 = vmatpush2.bf16.msra.mxu0 %v2853_v14 }
 0x1c2   :  { %1305 = vmatprep.subr.bf16.mxu1 %v2858_v15  ;;  %1346 = vmatprep.subr.bf16.mxu0 %v2861_v16 }
 0x1c5   :  { %1306 = vmatpush2.bf16.msra.mxu1 %v2856_v17  ;;  %1347 = vmatpush2.bf16.msra.mxu0 %v2859_v18  ;;  %v2886_v17 = vld [vmem:[#allocation8 + $0xe8] ss:$16 sps:$4 sm:$0xff]  }
 0x1c6   :  { %1307 = vmatprep.subr.bf16.mxu1 %v2864_v19  ;;  %1348 = vmatprep.subr.bf16.mxu0 %v2867_v20  ;;  %v2889_v18 = vld [vmem:[#allocation8 + $0x2e8] ss:$16 sps:$4 sm:$0xff]  }
 0x1c9   :  { %1308 = vmatpush2.bf16.msra.mxu1 %v2862_v21  ;;  %1349 = vmatpush2.bf16.msra.mxu0 %v2865_v22  ;;  %v2894_v21 = vld [vmem:[#allocation8 + $0xcc] ss:$16 sps:$4 sm:$0xff]  }
 0x1ca   :  { %1309 = vmatprep.subr.bf16.mxu1 %v2870_v23  ;;  %1350 = vmatprep.subr.bf16.mxu0 %v2873_v24  ;;  %v2897_v22 = vld [vmem:[#allocation8 + $0x2cc] ss:$16 sps:$4 sm:$0xff]   ;;  %v2892_v23 = vld [vmem:[#allocation8 + $0xc8] ss:$16 sps:$4 sm:$0xff]  }
 0x1cb   :  { %v2895_v24 = vld [vmem:[#allocation8 + $0x2c8] ss:$16 sps:$4 sm:$0xff]  }
 0x1cd   :  { %1310 = vmatpush2.bf16.msra.mxu1 %v2868_v25  ;;  %1351 = vmatpush2.bf16.msra.mxu0 %v2871_v26  ;;  %v2900_v25 = vld [vmem:[#allocation8 + $0xac] ss:$16 sps:$4 sm:$0xff]  }
 0x1ce   :  { %1311 = vmatprep.subr.bf16.mxu1 %v2876_v27  ;;  %1352 = vmatprep.subr.bf16.mxu0 %v2879_v28  ;;  %v2903_v26 = vld [vmem:[#allocation8 + $0x2ac] ss:$16 sps:$4 sm:$0xff]   ;;  %v2898_v27 = vld [vmem:[#allocation8 + $0xa8] ss:$16 sps:$4 sm:$0xff]  }
 0x1cf   :  { %v2901_v28 = vld [vmem:[#allocation8 + $0x2a8] ss:$16 sps:$4 sm:$0xff]  }
 0x1d1   :  { %1312 = vmatpush2.bf16.msra.mxu1 %v2874_v29  ;;  %1353 = vmatpush2.bf16.msra.mxu0 %v2877_v30  ;;  %v2906_v29 = vld [vmem:[#allocation8 + $0x8c] ss:$16 sps:$4 sm:$0xff]  }
 0x1d2   :  { %1313 = vmatprep.subr.bf16.mxu1 %v2882_v31  ;;  %1354 = vmatprep.subr.bf16.mxu0 %v2885_v32  ;;  %v2909_v30 = vld [vmem:[#allocation8 + $0x28c] ss:$16 sps:$4 sm:$0xff]   ;;  %v2904_v31 = vld [vmem:[#allocation8 + $0x88] ss:$16 sps:$4 sm:$0xff]  }
 0x1d3   :  { %v2907_v32 = vld [vmem:[#allocation8 + $0x288] ss:$16 sps:$4 sm:$0xff]  }
 0x1d5   :  { %1314 = vmatpush2.bf16.msra.mxu1 %v2880_v33  ;;  %1355 = vmatpush2.bf16.msra.mxu0 %v2883_v34  ;;  %v2912_v33 = vld [vmem:[#allocation8 + $0x6c] ss:$16 sps:$4 sm:$0xff]  }
 0x1d6   :  { %1365 = vmatprep.subr.bf16.mxu1 %v2888_v35  ;;  %1406 = vmatprep.subr.bf16.mxu0 %v2891_v36  ;;  %v2915_v34 = vld [vmem:[#allocation8 + $0x26c] ss:$16 sps:$4 sm:$0xff]   ;;  %v2910_v35 = vld [vmem:[#allocation8 + $0x68] ss:$16 sps:$4 sm:$0xff]  }
 0x1d7   :  { %v2913_v36 = vld [vmem:[#allocation8 + $0x268] ss:$16 sps:$4 sm:$0xff]  }
 0x250   :  { %v275_v38 = vpop.f32.mrf.mxu1  ;;  %v316_v39 = vpop.f32.mrf.mxu0 }
 0x252   :  { %v277_v40 = vpop.f32.mrf.mxu1  ;;  %v318_v41 = vpop.f32.mrf.mxu0 }
 0x254   :  { %v279_v44 = vpop.f32.mrf.mxu1  ;;  %v320_v45 = vpop.f32.mrf.mxu0 }
 0x255   :  { %v2927_v44 = vld [vmem:[#allocation8 + $0x22c] ss:$16 sps:$4 sm:$0xff]   ;;  %v2922_v45 = vld [vmem:[#allocation8 + $0x28] ss:$16 sps:$4 sm:$0xff]  }
 0x256   :  { %v280_v47 = vpop.f32.mrf.mxu1  ;;  %v321_v48 = vpop.f32.mrf.mxu0 }
 0x257   :  { %v2930_v47 = vld [vmem:[#allocation8 + $0xc] ss:$16 sps:$4 sm:$0xff]  }
 0x258   :  { %v403_v52 = vpop.f32.mrf.mxu1  ;;  %v444_v53 = vpop.f32.mrf.mxu0  ;;  %v2933_v48 = vld [vmem:[#allocation8 + $0x20c] ss:$16 sps:$4 sm:$0xff]  }
 0x259   :  { %v404_v54 = vadd.f32 %v403_v52, %v275_v38  ;;  %v445_v55 = vadd.f32 %v444_v53, %v316_v39  ;;  %v2921_v38 = vld [vmem:[#allocation8 + $0x24c] ss:$16 sps:$4 sm:$0xff]   ;;  %v2916_v39 = vld [vmem:[#allocation8 + $0x48] ss:$16 sps:$4 sm:$0xff]  }
 0x25a   :  { %v405_v56 = vpop.f32.mrf.mxu1  ;;  %v446_v58 = vpop.f32.mrf.mxu0  ;;  %v2936_v52 = vld [vmem:[#allocation8 + $0x1ec] ss:$16 sps:$4 sm:$0xff]  }
 0x25b   :  { %v473_v60 = vadd.f32 %v456_v11, %v404_v54  ;;  %v475_v61 = vadd.f32 %v464_v51, %v445_v55  ;;  %v406_v62 = vadd.f32 %v405_v56, %v277_v40  ;;  %v447_v63 = vadd.f32 %v446_v58, %v318_v41  ;;  %v2919_v40 = vld [vmem:[#allocation8 + $0x248] ss:$16 sps:$4 sm:$0xff]   ;;  %v2924_v41 = vld [vmem:[#allocation8 + $0x2c] ss:$16 sps:$4 sm:$0xff]  }
 0x25c   :  { %v407_v0 = vpop.f32.mrf.mxu1  ;;  %v448_v1 = vpop.f32.mrf.mxu0  ;;  %v2928_v11 = vld [vmem:[#allocation8 + $0x8] ss:$16 sps:$4 sm:$0xff]   ;;  %v2939_v53 = vld [vmem:[#allocation8 + $0x3ec] ss:$16 sps:$4 sm:$0xff]  }
 0x25d   :  { %v481_v2 = vmul.f32 0.2, %v473_v60  ;;  %v483_v3 = vmul.f32 0.2, %v475_v61  ;;  %vm477_vm5 = vcmp.gt.f32.partialorder %v473_v60, 0.0  ;;  %vm479_vm6 = vcmp.gt.f32.partialorder %v475_v61, 0.0 }
 0x25e   :  { %v474_v4 = vadd.f32 %v460_v57, %v406_v62  ;;  %v476_v5 = vadd.f32 %v468_v59, %v447_v63  ;;  %v408_v6 = vpop.f32.mrf.mxu1  ;;  %v449_v7 = vpop.f32.mrf.mxu0  ;;  %v2931_v51 = vld [vmem:[#allocation8 + $0x208] ss:$16 sps:$4 sm:$0xff]   ;;  %v2942_v56 = vld [vmem:[#allocation8 + $0x1cc] ss:$16 sps:$4 sm:$0xff]  }
 0x25f   :  { %v485_v10 = vsel %vm477_vm5, %v473_v60, %v481_v2  ;;  %v487_v12 = vsel %vm479_vm6, %v475_v61, %v483_v3  ;;  %v2934_v54 = vld [vmem:[#allocation8 + $0x1e8] ss:$16 sps:$4 sm:$0xff]   ;;  %v2945_v57 = vld [vmem:[#allocation8 + $0x3cc] ss:$16 sps:$4 sm:$0xff]  }
 0x260   :  { %v482_v8 = vmul.f32 0.2, %v474_v4  ;;  %v484_v9 = vmul.f32 0.2, %v476_v5  ;;  %vm478_vm7 = vcmp.gt.f32.partialorder %v474_v4, 0.0  ;;  %vm480_vm8 = vcmp.gt.f32.partialorder %v476_v5, 0.0 }
 0x261   :  { %v3445_v19 = vpack.c.bf16 %v485_v10, %v485_v10  ;;  %v3447_v20 = vpack.c.bf16 %v487_v12, %v487_v12  ;;  %v2937_v55 = vld [vmem:[#allocation8 + $0x3e8] ss:$16 sps:$4 sm:$0xff]   ;;  %v2948_v60 = vld [vmem:[#allocation8 + $0x1ac] ss:$16 sps:$4 sm:$0xff]  }
 0x262   :  { %v486_v13 = vsel %vm478_vm7, %v474_v4, %v482_v8  ;;  %v488_v14 = vsel %vm480_vm8, %v476_v5, %v484_v9  ;;  %v2940_v58 = vld [vmem:[#allocation8 + $0x1c8] ss:$16 sps:$4 sm:$0xff]   ;;  %v2951_v61 = vld [vmem:[#allocation8 + $0x3ac] ss:$16 sps:$4 sm:$0xff]  }
 0x263   :  { %v490_v15 = vpack.c.bf16 %v486_v13, %v486_v13  ;;  %v492_v16 = vpack.c.bf16 %v488_v14, %v488_v14  ;;  %v2943_v59 = vld [vmem:[#allocation8 + $0x3c8] ss:$16 sps:$4 sm:$0xff]   ;;  %v2954_v0 = vld [vmem:[#allocation8 + $0x18c] ss:$16 sps:$4 sm:$0xff]  }
 0x264   :  { %v2946_v62 = vld [vmem:[#allocation8 + $0x1a8] ss:$16 sps:$4 sm:$0xff]   ;;  %v2957_v1 = vld [vmem:[#allocation8 + $0x38c] ss:$16 sps:$4 sm:$0xff]  }
 0x265   :  { %1315 = vmatprep.mubr.bf16.mxu1 %v490_v15  ;;  %1356 = vmatprep.mubr.bf16.mxu0 %v492_v16  ;;  %v2949_v63 = vld [vmem:[#allocation8 + $0x3a8] ss:$16 sps:$4 sm:$0xff]   ;;  %v2960_v4 = vld [vmem:[#allocation8 + $0x16c] ss:$16 sps:$4 sm:$0xff]  }
 0x266   :  { %1316 = vmatmul.mubr.bf16.vlgmr.msra.gmra.mxu1 %v3445_v19  ;;  %1357 = vmatmul.mubr.bf16.vlgmr.msra.gmra.mxu0 %v3447_v20  ;;  %v2952_v2 = vld [vmem:[#allocation8 + $0x188] ss:$16 sps:$4 sm:$0xff]   ;;  %v2963_v5 = vld [vmem:[#allocation8 + $0x36c] ss:$16 sps:$4 sm:$0xff]  }
 0x267   :  { %1366 = vmatpush1.bf16.msra.mxu1 %v2886_v17  ;;  %1407 = vmatpush1.bf16.msra.mxu0 %v2889_v18  ;;  %v2955_v3 = vld [vmem:[#allocation8 + $0x388] ss:$16 sps:$4 sm:$0xff]   ;;  %v2966_v8 = vld [vmem:[#allocation8 + $0x14c] ss:$16 sps:$4 sm:$0xff]  }
 0x268   :  { %1397 = vmatprep.mubr.bf16.mxu1 %v490_v15  ;;  %1438 = vmatprep.mubr.bf16.mxu0 %v492_v16  ;;  %v2958_v6 = vld [vmem:[#allocation8 + $0x168] ss:$16 sps:$4 sm:$0xff]   ;;  %v2969_v9 = vld [vmem:[#allocation8 + $0x34c] ss:$16 sps:$4 sm:$0xff]  }
 0x269   :  { %1367 = vmatprep.subr.bf16.mxu1 %v2894_v21  ;;  %1408 = vmatprep.subr.bf16.mxu0 %v2897_v22  ;;  %v2961_v7 = vld [vmem:[#allocation8 + $0x368] ss:$16 sps:$4 sm:$0xff]   ;;  %v2972_v13 = vld [vmem:[#allocation8 + $0x12c] ss:$16 sps:$4 sm:$0xff]  }
 0x26a   :  { %v2964_v10 = vld [vmem:[#allocation8 + $0x148] ss:$16 sps:$4 sm:$0xff]   ;;  %v2975_v14 = vld [vmem:[#allocation8 + $0x32c] ss:$16 sps:$4 sm:$0xff]  }
 0x26b   :  { %1368 = vmatpush1.bf16.msra.mxu1 %v2892_v23  ;;  %1409 = vmatpush1.bf16.msra.mxu0 %v2895_v24  ;;  %v2967_v12 = vld [vmem:[#allocation8 + $0x348] ss:$16 sps:$4 sm:$0xff]   ;;  %v2978_v17 = vld [vmem:[#allocation8 + $0x10c] ss:$16 sps:$4 sm:$0xff]   ;;  %v2982_v24 = vld [vmem:[#allocation11 + $0xe0] ss:$16 sps:$4 sm:$0xff]  }
 0x26c   :  { %1369 = vmatprep.subr.bf16.mxu1 %v2900_v25  ;;  %1410 = vmatprep.subr.bf16.mxu0 %v2903_v26  ;;  %v2970_v15 = vld [vmem:[#allocation8 + $0x128] ss:$16 sps:$4 sm:$0xff]   ;;  %v2981_v18 = vld [vmem:[#allocation8 + $0x30c] ss:$16 sps:$4 sm:$0xff]   ;;  %v2985_v26 = vld [vmem:[#allocation11 + $0xc0] ss:$16 sps:$4 sm:$0xff]  }
 0x26d   :  { %v2973_v16 = vld [vmem:[#allocation8 + $0x328] ss:$16 sps:$4 sm:$0xff]  }
 0x26e   :  { %v2976_v21 = vld [vmem:[#allocation8 + $0x108] ss:$16 sps:$4 sm:$0xff]  }
 0x26f   :  { %1370 = vmatpush1.bf16.msra.mxu1 %v2898_v27  ;;  %1411 = vmatpush1.bf16.msra.mxu0 %v2901_v28  ;;  %v2979_v22 = vld [vmem:[#allocation8 + $0x308] ss:$16 sps:$4 sm:$0xff]   ;;  %v2988_v28 = vld [vmem:[#allocation11 + $0xa0] ss:$16 sps:$4 sm:$0xff]  }
 0x270   :  { %1371 = vmatprep.subr.bf16.mxu1 %v2906_v29  ;;  %1412 = vmatprep.subr.bf16.mxu0 %v2909_v30  ;;  %v2984_v23 = vld [vmem:[#allocation11 + $0xe4] ss:$16 sps:$4 sm:$0xff]   ;;  %v3030_v30 = vld [vmem:[#allocation11 + $0x2e0] ss:$16 sps:$4 sm:$0xff]  }
 0x271   :  { %v2987_v25 = vld [vmem:[#allocation11 + $0xc4] ss:$16 sps:$4 sm:$0xff]  }
 0x272   :  { %v2990_v27 = vld [vmem:[#allocation11 + $0xa4] ss:$16 sps:$4 sm:$0xff]  }
 0x273   :  { %1372 = vmatpush1.bf16.msra.mxu1 %v2904_v31  ;;  %1413 = vmatpush1.bf16.msra.mxu0 %v2907_v32  ;;  %v2993_v29 = vld [vmem:[#allocation11 + $0x84] ss:$16 sps:$4 sm:$0xff]   ;;  %v2991_v32 = vld [vmem:[#allocation11 + $0x80] ss:$16 sps:$4 sm:$0xff]  }
 0x274   :  { %1373 = vmatprep.subr.bf16.mxu1 %v2912_v33  ;;  %1414 = vmatprep.subr.bf16.mxu0 %v2915_v34  ;;  %v3032_v31 = vld [vmem:[#allocation11 + $0x2e4] ss:$16 sps:$4 sm:$0xff]   ;;  %v3036_v34 = vld [vmem:[#allocation11 + $0x2c0] ss:$16 sps:$4 sm:$0xff]  }
 0x275   :  { %v2996_v33 = vld [vmem:[#allocation11 + $0x64] ss:$16 sps:$4 sm:$0xff]  }
 0x277   :  { %1374 = vmatpush1.bf16.msra.mxu1 %v2910_v35  ;;  %1415 = vmatpush1.bf16.msra.mxu0 %v2913_v36  ;;  %v3038_v35 = vld [vmem:[#allocation11 + $0x2c4] ss:$16 sps:$4 sm:$0xff]   ;;  %v2997_v36 = vld [vmem:[#allocation11 + $0x40] ss:$16 sps:$4 sm:$0xff]  }
 0x278   :  { %1375 = vmatprep.subr.bf16.mxu1 %v2918_v37  ;;  %1416 = vmatprep.subr.bf16.mxu0 %v2921_v38  ;;  %v3002_v37 = vld [vmem:[#allocation11 + $0x24] ss:$16 sps:$4 sm:$0xff]   ;;  %v3042_v38 = vld [vmem:[#allocation11 + $0x2a0] ss:$16 sps:$4 sm:$0xff]  }
 0x27b   :  { %1376 = vmatpush1.bf16.msra.mxu1 %v2916_v39  ;;  %1417 = vmatpush1.bf16.msra.mxu0 %v2919_v40  ;;  %v3044_v39 = vld [vmem:[#allocation11 + $0x2a4] ss:$16 sps:$4 sm:$0xff]   ;;  %v3000_v40 = vld [vmem:[#allocation11 + $0x20] ss:$16 sps:$4 sm:$0xff]  }
 0x27c   :  { %1377 = vmatprep.subr.bf16.mxu1 %v2924_v41  ;;  %1418 = vmatprep.subr.bf16.mxu0 %v2927_v44  ;;  %v3005_v41 = vld [vmem:[#allocation11 + $0x4] ss:$16 sps:$4 sm:$0xff]   ;;  %v3048_v44 = vld [vmem:[#allocation11 + $0x280] ss:$16 sps:$4 sm:$0xff]  }
 0x27f   :  { %1378 = vmatpush1.bf16.msra.mxu1 %v2922_v45  ;;  %1419 = vmatpush1.bf16.msra.mxu0 %v2925_v46  ;;  %v3050_v45 = vld [vmem:[#allocation11 + $0x284] ss:$16 sps:$4 sm:$0xff]   ;;  %v3003_v46 = vld [vmem:[#allocation11] ss:$16 sps:$4 sm:$0xff]  }
 0x280   :  { %1379 = vmatprep.subr.bf16.mxu1 %v2930_v47  ;;  %1420 = vmatprep.subr.bf16.mxu0 %v2933_v48  ;;  %v3008_v47 = vld [vmem:[#allocation11 + $0x1e4] ss:$16 sps:$4 sm:$0xff]   ;;  %v3054_v48 = vld [vmem:[#allocation11 + $0x260] ss:$16 sps:$4 sm:$0xff]  }
 0x283   :  { %1380 = vmatpush1.bf16.msra.mxu1 %v2928_v11  ;;  %1421 = vmatpush1.bf16.msra.mxu0 %v2931_v51  ;;  %v3056_v11 = vld [vmem:[#allocation11 + $0x264] ss:$16 sps:$4 sm:$0xff]   ;;  %v3006_v51 = vld [vmem:[#allocation11 + $0x1e0] ss:$16 sps:$4 sm:$0xff]  }
 0x284   :  { %1381 = vmatprep.subr.bf16.mxu1 %v2936_v52  ;;  %1422 = vmatprep.subr.bf16.mxu0 %v2939_v53  ;;  %v3011_v52 = vld [vmem:[#allocation11 + $0x1c4] ss:$16 sps:$4 sm:$0xff]   ;;  %v3060_v53 = vld [vmem:[#allocation11 + $0x240] ss:$16 sps:$4 sm:$0xff]  }
 0x287   :  { %1382 = vmatpush2.bf16.msra.mxu1 %v2934_v54  ;;  %1423 = vmatpush2.bf16.msra.mxu0 %v2937_v55  ;;  %v3062_v54 = vld [vmem:[#allocation11 + $0x244] ss:$16 sps:$4 sm:$0xff]   ;;  %v3009_v55 = vld [vmem:[#allocation11 + $0x1c0] ss:$16 sps:$4 sm:$0xff]  }
 0x288   :  { %1383 = vmatprep.subr.bf16.mxu1 %v2942_v56  ;;  %1424 = vmatprep.subr.bf16.mxu0 %v2945_v57  ;;  %v3014_v56 = vld [vmem:[#allocation11 + $0x1a4] ss:$16 sps:$4 sm:$0xff]   ;;  %v3066_v57 = vld [vmem:[#allocation11 + $0x220] ss:$16 sps:$4 sm:$0xff]  }
 0x28b   :  { %1384 = vmatpush2.bf16.msra.mxu1 %v2940_v58  ;;  %1425 = vmatpush2.bf16.msra.mxu0 %v2943_v59  ;;  %v3068_v58 = vld [vmem:[#allocation11 + $0x224] ss:$16 sps:$4 sm:$0xff]   ;;  %v3012_v59 = vld [vmem:[#allocation11 + $0x1a0] ss:$16 sps:$4 sm:$0xff]  }
 0x28c   :  { %1385 = vmatprep.subr.bf16.mxu1 %v2948_v60  ;;  %1426 = vmatprep.subr.bf16.mxu0 %v2951_v61  ;;  %v3017_v60 = vld [vmem:[#allocation11 + $0x184] ss:$16 sps:$4 sm:$0xff]   ;;  %v3072_v61 = vld [vmem:[#allocation11 + $0x200] ss:$16 sps:$4 sm:$0xff]  }
 0x28f   :  { %1386 = vmatpush2.bf16.msra.mxu1 %v2946_v62  ;;  %1427 = vmatpush2.bf16.msra.mxu0 %v2949_v63  ;;  %v3074_v62 = vld [vmem:[#allocation11 + $0x204] ss:$16 sps:$4 sm:$0xff]   ;;  %v3015_v63 = vld [vmem:[#allocation11 + $0x180] ss:$16 sps:$4 sm:$0xff]  }
 0x290   :  { %1387 = vmatprep.subr.bf16.mxu1 %v2954_v0  ;;  %1428 = vmatprep.subr.bf16.mxu0 %v2957_v1  ;;  %v3020_v0 = vld [vmem:[#allocation11 + $0x164] ss:$16 sps:$4 sm:$0xff]   ;;  %v3078_v1 = vld [vmem:[#allocation11 + $0x3e0] ss:$16 sps:$4 sm:$0xff]  }
 0x293   :  { %1388 = vmatpush2.bf16.msra.mxu1 %v2952_v2  ;;  %1429 = vmatpush2.bf16.msra.mxu0 %v2955_v3  ;;  %v3080_v2 = vld [vmem:[#allocation11 + $0x3e4] ss:$16 sps:$4 sm:$0xff]   ;;  %v3018_v3 = vld [vmem:[#allocation11 + $0x160] ss:$16 sps:$4 sm:$0xff]  }
 0x294   :  { %1389 = vmatprep.subr.bf16.mxu1 %v2960_v4  ;;  %1430 = vmatprep.subr.bf16.mxu0 %v2963_v5  ;;  %v3023_v4 = vld [vmem:[#allocation11 + $0x144] ss:$16 sps:$4 sm:$0xff]   ;;  %v3084_v5 = vld [vmem:[#allocation11 + $0x3c0] ss:$16 sps:$4 sm:$0xff]  }
 0x297   :  { %1390 = vmatpush2.bf16.msra.mxu1 %v2958_v6  ;;  %1431 = vmatpush2.bf16.msra.mxu0 %v2961_v7  ;;  %v3086_v6 = vld [vmem:[#allocation11 + $0x3c4] ss:$16 sps:$4 sm:$0xff]   ;;  %v3021_v7 = vld [vmem:[#allocation11 + $0x140] ss:$16 sps:$4 sm:$0xff]  }
 0x298   :  { %1391 = vmatprep.subr.bf16.mxu1 %v2966_v8  ;;  %1432 = vmatprep.subr.bf16.mxu0 %v2969_v9  ;;  %v3026_v8 = vld [vmem:[#allocation11 + $0x124] ss:$16 sps:$4 sm:$0xff]   ;;  %v3090_v9 = vld [vmem:[#allocation11 + $0x3a0] ss:$16 sps:$4 sm:$0xff]  }
 0x29b   :  { %1392 = vmatpush2.bf16.msra.mxu1 %v2964_v10  ;;  %1433 = vmatpush2.bf16.msra.mxu0 %v2967_v12  ;;  %v3092_v10 = vld [vmem:[#allocation11 + $0x3a4] ss:$16 sps:$4 sm:$0xff]   ;;  %v3024_v12 = vld [vmem:[#allocation11 + $0x120] ss:$16 sps:$4 sm:$0xff]  }
 0x29c   :  { %1393 = vmatprep.subr.bf16.mxu1 %v2972_v13  ;;  %1434 = vmatprep.subr.bf16.mxu0 %v2975_v14  ;;  %v3029_v13 = vld [vmem:[#allocation11 + $0x104] ss:$16 sps:$4 sm:$0xff]   ;;  %v3096_v14 = vld [vmem:[#allocation11 + $0x380] ss:$16 sps:$4 sm:$0xff]  }
 0x29f   :  { %1394 = vmatpush2.bf16.msra.mxu1 %v2970_v15  ;;  %1435 = vmatpush2.bf16.msra.mxu0 %v2973_v16  ;;  %v3098_v15 = vld [vmem:[#allocation11 + $0x384] ss:$16 sps:$4 sm:$0xff]   ;;  %v3027_v16 = vld [vmem:[#allocation11 + $0x100] ss:$16 sps:$4 sm:$0xff]  }
 0x2a0   :  { %1395 = vmatprep.subr.bf16.mxu1 %v2978_v17  ;;  %1436 = vmatprep.subr.bf16.mxu0 %v2981_v18  ;;  %v3035_v17 = vld [vmem:[#allocation11 + $0xec] ss:$16 sps:$4 sm:$0xff]   ;;  %v3102_v18 = vld [vmem:[#allocation11 + $0x360] ss:$16 sps:$4 sm:$0xff]  }
 0x2a3   :  { %1396 = vmatpush2.bf16.msra.mxu1 %v2976_v21  ;;  %1437 = vmatpush2.bf16.msra.mxu0 %v2979_v22  ;;  %v3104_v21 = vld [vmem:[#allocation11 + $0x364] ss:$16 sps:$4 sm:$0xff]  }
 0x2a4   :  { %2253 = vmatprep.subr.bf16.mxu1 %v2984_v23  ;;  %2294 = vmatprep.subr.bf16.mxu0 %v3032_v31  ;;  %v3110_v22 = vld [vmem:[#allocation11 + $0x344] ss:$16 sps:$4 sm:$0xff]   ;;  %v3108_v23 = vld [vmem:[#allocation11 + $0x340] ss:$16 sps:$4 sm:$0xff]  }
 0x2a6   :  { %1398 = vmatmul.mubr.bf16.vlgmr.msra.gmra.mxu1 %v3445_v19  ;;  %1439 = vmatmul.mubr.bf16.vlgmr.msra.gmra.mxu0 %v3447_v20  ;;  %v2994_v19 = vld [vmem:[#allocation11 + $0x60] ss:$16 sps:$4 sm:$0xff]   ;;  %v2999_v20 = vld [vmem:[#allocation11 + $0x44] ss:$16 sps:$4 sm:$0xff]  }
 0x2a7   :  { %2254 = vmatpush1.bf16.msra.mxu1 %v2982_v24  ;;  %2295 = vmatpush1.bf16.msra.mxu0 %v3030_v30  ;;  %v3116_v24 = vld [vmem:[#allocation11 + $0x324] ss:$16 sps:$4 sm:$0xff]  }
 0x2a8   :  { %2255 = vmatprep.subr.bf16.mxu1 %v2987_v25  ;;  %2296 = vmatprep.subr.bf16.mxu0 %v3038_v35  ;;  %v3114_v25 = vld [vmem:[#allocation11 + $0x320] ss:$16 sps:$4 sm:$0xff]  }
 0x2ab   :  { %2256 = vmatpush1.bf16.msra.mxu1 %v2985_v26  ;;  %2297 = vmatpush1.bf16.msra.mxu0 %v3036_v34  ;;  %v3122_v26 = vld [vmem:[#allocation11 + $0x304] ss:$16 sps:$4 sm:$0xff]  }
 0x2ac   :  { %2257 = vmatprep.subr.bf16.mxu1 %v2990_v27  ;;  %2298 = vmatprep.subr.bf16.mxu0 %v3044_v39  ;;  %v3120_v27 = vld [vmem:[#allocation11 + $0x300] ss:$16 sps:$4 sm:$0xff]  }
 0x2af   :  { %2258 = vmatpush1.bf16.msra.mxu1 %v2988_v28  ;;  %2299 = vmatpush1.bf16.msra.mxu0 %v3042_v38  ;;  %v3128_v28 = vld [vmem:[#allocation11 + $0x2ec] ss:$16 sps:$4 sm:$0xff]  }
 0x2b0   :  { %2259 = vmatprep.subr.bf16.mxu1 %v2993_v29  ;;  %2300 = vmatprep.subr.bf16.mxu0 %v3050_v45  ;;  %v3453_v29 = vld [vmem:[#allocation10] sm:$0xf] }
 0x2b1   :  { %v626_v30 = vrot.slane %v3453_v29, %v3430_v42  ;;  %v630_v31 = vrot.slane %v3453_v29, %v3437_v49 }
 0x2b3   :  { %2260 = vmatpush1.bf16.msra.mxu1 %v2991_v32  ;;  %2301 = vmatpush1.bf16.msra.mxu0 %v3048_v44 }
 0x2b4   :  { %2261 = vmatprep.subr.bf16.mxu1 %v2996_v33  ;;  %2302 = vmatprep.subr.bf16.mxu0 %v3056_v11  ;;  %v3033_v11 = vld [vmem:[#allocation11 + $0xe8] ss:$16 sps:$4 sm:$0xff]  }
 0x2b7   :  { %2262 = vmatpush1.bf16.msra.mxu1 %v2994_v19  ;;  %2303 = vmatpush1.bf16.msra.mxu0 %v3054_v48 }
 0x2b8   :  { %2263 = vmatprep.subr.bf16.mxu1 %v2999_v20  ;;  %2304 = vmatprep.subr.bf16.mxu0 %v3062_v54  ;;  %v3047_v54 = vld [vmem:[#allocation11 + $0xac] ss:$16 sps:$4 sm:$0xff]  }
 0x2bb   :  { %2264 = vmatpush1.bf16.msra.mxu1 %v2997_v36  ;;  %2305 = vmatpush1.bf16.msra.mxu0 %v3060_v53  ;;  %v3039_v53 = vld [vmem:[#allocation11 + $0xc8] ss:$16 sps:$4 sm:$0xff]  }
 0x2bc   :  { %2265 = vmatprep.subr.bf16.mxu1 %v3002_v37  ;;  %2306 = vmatprep.subr.bf16.mxu0 %v3068_v58  ;;  %v3059_v58 = vld [vmem:[#allocation11 + $0x6c] ss:$16 sps:$4 sm:$0xff]  }
 0x2bf   :  { %2266 = vmatpush1.bf16.msra.mxu1 %v3000_v40  ;;  %2307 = vmatpush1.bf16.msra.mxu0 %v3066_v57  ;;  %v3051_v57 = vld [vmem:[#allocation11 + $0x88] ss:$16 sps:$4 sm:$0xff]  }
 0x2c0   :  { %2267 = vmatprep.subr.bf16.mxu1 %v3005_v41  ;;  %2308 = vmatprep.subr.bf16.mxu0 %v3074_v62  ;;  %v3071_v62 = vld [vmem:[#allocation11 + $0x2c] ss:$16 sps:$4 sm:$0xff]  }
 0x2c3   :  { %2268 = vmatpush1.bf16.msra.mxu1 %v3003_v46  ;;  %2309 = vmatpush1.bf16.msra.mxu0 %v3072_v61  ;;  %v3063_v61 = vld [vmem:[#allocation11 + $0x48] ss:$16 sps:$4 sm:$0xff]  }
 0x2c4   :  { %2269 = vmatprep.subr.bf16.mxu1 %v3008_v47  ;;  %2310 = vmatprep.subr.bf16.mxu0 %v3080_v2  ;;  %v3083_v2 = vld [vmem:[#allocation11 + $0x1ec] ss:$16 sps:$4 sm:$0xff]  }
 0x2c7   :  { %2270 = vmatpush2.bf16.msra.mxu1 %v3006_v51  ;;  %2311 = vmatpush2.bf16.msra.mxu0 %v3078_v1  ;;  %v3075_v1 = vld [vmem:[#allocation11 + $0x8] ss:$16 sps:$4 sm:$0xff]  }
 0x2c8   :  { %2271 = vmatprep.subr.bf16.mxu1 %v3011_v52  ;;  %2312 = vmatprep.subr.bf16.mxu0 %v3086_v6  ;;  %v3041_v52 = vld [vmem:[#allocation11 + $0xcc] ss:$16 sps:$4 sm:$0xff]  }
 0x2c9   :  { %v3095_v6 = vld [vmem:[#allocation11 + $0x1ac] ss:$16 sps:$4 sm:$0xff]  }
 0x2cb   :  { %2272 = vmatpush2.bf16.msra.mxu1 %v3009_v55  ;;  %2313 = vmatpush2.bf16.msra.mxu0 %v3084_v5  ;;  %v3045_v55 = vld [vmem:[#allocation11 + $0xa8] ss:$16 sps:$4 sm:$0xff]  }
 0x2cc   :  { %2273 = vmatprep.subr.bf16.mxu1 %v3014_v56  ;;  %2314 = vmatprep.subr.bf16.mxu0 %v3092_v10  ;;  %v3053_v56 = vld [vmem:[#allocation11 + $0x8c] ss:$16 sps:$4 sm:$0xff]   ;;  %v3087_v5 = vld [vmem:[#allocation11 + $0x1c8] ss:$16 sps:$4 sm:$0xff]  }
 0x2cd   :  { %v3107_v10 = vld [vmem:[#allocation11 + $0x16c] ss:$16 sps:$4 sm:$0xff]  }
 0x2cf   :  { %2274 = vmatpush2.bf16.msra.mxu1 %v3012_v59  ;;  %2315 = vmatpush2.bf16.msra.mxu0 %v3090_v9  ;;  %v3057_v59 = vld [vmem:[#allocation11 + $0x68] ss:$16 sps:$4 sm:$0xff]  }
 0x2d0   :  { %2275 = vmatprep.subr.bf16.mxu1 %v3017_v60  ;;  %2316 = vmatprep.subr.bf16.mxu0 %v3098_v15  ;;  %v3065_v60 = vld [vmem:[#allocation11 + $0x4c] ss:$16 sps:$4 sm:$0xff]   ;;  %v3099_v9 = vld [vmem:[#allocation11 + $0x188] ss:$16 sps:$4 sm:$0xff]  }
 0x2d1   :  { %v3111_v15 = vld [vmem:[#allocation11 + $0x148] ss:$16 sps:$4 sm:$0xff]  }
 0x2d3   :  { %2276 = vmatpush2.bf16.msra.mxu1 %v3015_v63  ;;  %2317 = vmatpush2.bf16.msra.mxu0 %v3096_v14  ;;  %v3069_v63 = vld [vmem:[#allocation11 + $0x28] ss:$16 sps:$4 sm:$0xff]   ;;  %v634_v14 = vrot.slane %v3453_v29, %v3432_v43 }
 0x2d4   :  { %2277 = vmatprep.subr.bf16.mxu1 %v3020_v0  ;;  %2318 = vmatprep.subr.bf16.mxu0 %v3104_v21  ;;  %v3077_v0 = vld [vmem:[#allocation11 + $0xc] ss:$16 sps:$4 sm:$0xff]  }
 0x2d7   :  { %2278 = vmatpush2.bf16.msra.mxu1 %v3018_v3  ;;  %2319 = vmatpush2.bf16.msra.mxu0 %v3102_v18  ;;  %v3081_v3 = vld [vmem:[#allocation11 + $0x1e8] ss:$16 sps:$4 sm:$0xff]  }
 0x2d8   :  { %2279 = vmatprep.subr.bf16.mxu1 %v3023_v4  ;;  %2320 = vmatprep.subr.bf16.mxu0 %v3110_v22  ;;  %v3089_v4 = vld [vmem:[#allocation11 + $0x1cc] ss:$16 sps:$4 sm:$0xff]  }
 0x2db   :  { %2280 = vmatpush2.bf16.msra.mxu1 %v3021_v7  ;;  %2321 = vmatpush2.bf16.msra.mxu0 %v3108_v23  ;;  %v3093_v7 = vld [vmem:[#allocation11 + $0x1a8] ss:$16 sps:$4 sm:$0xff]  }
 0x2dc   :  { %2281 = vmatprep.subr.bf16.mxu1 %v3026_v8  ;;  %2322 = vmatprep.subr.bf16.mxu0 %v3116_v24  ;;  %v3101_v8 = vld [vmem:[#allocation11 + $0x18c] ss:$16 sps:$4 sm:$0xff]  }
 0x2df   :  { %2282 = vmatpush2.bf16.msra.mxu1 %v3024_v12  ;;  %2323 = vmatpush2.bf16.msra.mxu0 %v3114_v25  ;;  %v3105_v12 = vld [vmem:[#allocation11 + $0x168] ss:$16 sps:$4 sm:$0xff]  }
 0x2e0   :  { %2283 = vmatprep.subr.bf16.mxu1 %v3029_v13  ;;  %2324 = vmatprep.subr.bf16.mxu0 %v3122_v26  ;;  %v3113_v13 = vld [vmem:[#allocation11 + $0x14c] ss:$16 sps:$4 sm:$0xff]   ;;  %v3117_v25 = vld [vmem:[#allocation11 + $0x128] ss:$16 sps:$4 sm:$0xff]  }
 0x2e3   :  { %2284 = vmatpush2.bf16.msra.mxu1 %v3027_v16  ;;  %2325 = vmatpush2.bf16.msra.mxu0 %v3120_v27  ;;  %v638_v16 = vrot.slane %v3453_v29, %v3439_v50  ;;  %v3123_v29 = vld [vmem:[#allocation11 + $0x108] ss:$16 sps:$4 sm:$0xff]  }
 0x2e4   :  { %2335 = vmatprep.subr.bf16.mxu1 %v3035_v17  ;;  %2376 = vmatprep.subr.bf16.mxu0 %v3128_v28  ;;  %v3119_v17 = vld [vmem:[#allocation11 + $0x12c] ss:$16 sps:$4 sm:$0xff]  }
 0x2e5   :  { %v3125_v28 = vld [vmem:[#allocation11 + $0x10c] ss:$16 sps:$4 sm:$0xff]  }
 0x326   :  { %v1317_v32 = vpop.f32.mrf.mxu1  ;;  %v1358_v33 = vpop.f32.mrf.mxu0 }
 0x327   :  { %v1318_v19 = vadd.f32 %v1317_v32, %v626_v30 }
 0x328   :  { %v1319_v20 = vpop.f32.mrf.mxu1  ;;  %v1360_v34 = vpop.f32.mrf.mxu0 }
 0x329   :  { %v1359_v35 = vadd.f32 %v1358_v33, %v1318_v19  ;;  %v1320_v36 = vadd.f32 %v1319_v20, %v630_v31 }
 0x32a   :  { %v1321_v37 = vpop.f32.mrf.mxu1  ;;  %v1362_v38 = vpop.f32.mrf.mxu0 }
 0x32b   :  { %vm1447_vm9 = vcmp.gt.f32.partialorder %v1359_v35, 0.0  ;;  %v1451_v39 = vmul.f32 0.2, %v1359_v35  ;;  %v1361_v40 = vadd.f32 %v1360_v34, %v1320_v36  ;;  %v3126_v38 = vld [vmem:[#allocation11 + $0x2e8] ss:$16 sps:$4 sm:$0xff]  }
 0x32c   :  { %v1322_v41 = vpop.f32.mrf.mxu1  ;;  %v1363_v44 = vpop.f32.mrf.mxu0 }
 0x32d   :  { %vm1448_vm10 = vcmp.gt.f32.partialorder %v1361_v40, 0.0  ;;  %v1452_v45 = vmul.f32 0.2, %v1361_v40  ;;  %v1455_v46 = vsel %vm1447_vm9, %v1359_v35, %v1451_v39  ;;  %v3129_v41 = vld [vmem:[#allocation11 + $0x2c8] ss:$16 sps:$4 sm:$0xff]  }
 0x32e   :  { %v3459_v51 = vpack.c.bf16 %v1455_v46, %v1455_v46  ;;  %v3134_v44 = vld [vmem:[#allocation11 + $0x2ac] ss:$16 sps:$4 sm:$0xff]  }
 0x32f   :  { %v1456_v47 = vsel %vm1448_vm10, %v1361_v40, %v1452_v45  ;;  %v3131_v40 = vld [vmem:[#allocation11 + $0x2cc] ss:$16 sps:$4 sm:$0xff]   ;;  %v3132_v45 = vld [vmem:[#allocation11 + $0x2a8] ss:$16 sps:$4 sm:$0xff]  }
 0x330   :  { %v1460_v48 = vpack.c.bf16 %v1456_v47, %v1456_v47  ;;  %v3137_v46 = vld [vmem:[#allocation11 + $0x28c] ss:$16 sps:$4 sm:$0xff]   ;;  %v3135_v47 = vld [vmem:[#allocation11 + $0x288] ss:$16 sps:$4 sm:$0xff]  }
 0x332   :  { %2285 = vmatprep.mubr.bf16.mxu1 %v1460_v48 }
 0x333   :  { %2286 = vmatmul.mubr.bf16.vlgmr.msra.gmra.mxu1 %v3459_v51 }
 0x334   :  { %2336 = vmatpush1.bf16.msra.mxu1 %v3033_v11  ;;  %2367 = vmatprep.mubr.bf16.mxu1 %v1460_v48  ;;  %v3140_v48 = vld [vmem:[#allocation11 + $0x26c] ss:$16 sps:$4 sm:$0xff]   ;;  %v3138_v11 = vld [vmem:[#allocation11 + $0x268] ss:$16 sps:$4 sm:$0xff]  }
 0x335   :  { %2337 = vmatprep.subr.bf16.mxu1 %v3041_v52  ;;  %v3143_v52 = vld [vmem:[#allocation11 + $0x24c] ss:$16 sps:$4 sm:$0xff]  }
 0x338   :  { %2338 = vmatpush1.bf16.msra.mxu1 %v3039_v53  ;;  %v3141_v53 = vld [vmem:[#allocation11 + $0x248] ss:$16 sps:$4 sm:$0xff]  }
 0x339   :  { %2339 = vmatprep.subr.bf16.mxu1 %v3047_v54  ;;  %v3144_v54 = vld [vmem:[#allocation11 + $0x228] ss:$16 sps:$4 sm:$0xff]  }
 0x33c   :  { %2340 = vmatpush1.bf16.msra.mxu1 %v3045_v55  ;;  %v3149_v55 = vld [vmem:[#allocation11 + $0x20c] ss:$16 sps:$4 sm:$0xff]  }
 0x33d   :  { %2341 = vmatprep.subr.bf16.mxu1 %v3053_v56  ;;  %v3147_v56 = vld [vmem:[#allocation11 + $0x208] ss:$16 sps:$4 sm:$0xff]  }
 0x340   :  { %2342 = vmatpush1.bf16.msra.mxu1 %v3051_v57  ;;  %v3152_v57 = vld [vmem:[#allocation11 + $0x3ec] ss:$16 sps:$4 sm:$0xff]  }
 0x341   :  { %2343 = vmatprep.subr.bf16.mxu1 %v3059_v58  ;;  %v3150_v58 = vld [vmem:[#allocation11 + $0x3e8] ss:$16 sps:$4 sm:$0xff]  }
 0x344   :  { %2344 = vmatpush1.bf16.msra.mxu1 %v3057_v59  ;;  %v3155_v59 = vld [vmem:[#allocation11 + $0x3cc] ss:$16 sps:$4 sm:$0xff]  }
 0x345   :  { %2345 = vmatprep.subr.bf16.mxu1 %v3065_v60  ;;  %v3153_v60 = vld [vmem:[#allocation11 + $0x3c8] ss:$16 sps:$4 sm:$0xff]  }
 0x348   :  { %2346 = vmatpush1.bf16.msra.mxu1 %v3063_v61  ;;  %v3158_v61 = vld [vmem:[#allocation11 + $0x3ac] ss:$16 sps:$4 sm:$0xff]  }
 0x349   :  { %2347 = vmatprep.subr.bf16.mxu1 %v3071_v62  ;;  %v3156_v62 = vld [vmem:[#allocation11 + $0x3a8] ss:$16 sps:$4 sm:$0xff]  }
 0x34c   :  { %2348 = vmatpush1.bf16.msra.mxu1 %v3069_v63  ;;  %v3161_v63 = vld [vmem:[#allocation11 + $0x38c] ss:$16 sps:$4 sm:$0xff]  }
 0x34d   :  { %2349 = vmatprep.subr.bf16.mxu1 %v3077_v0  ;;  %v3159_v0 = vld [vmem:[#allocation11 + $0x388] ss:$16 sps:$4 sm:$0xff]  }
 0x350   :  { %2350 = vmatpush1.bf16.msra.mxu1 %v3075_v1  ;;  %v3164_v1 = vld [vmem:[#allocation11 + $0x36c] ss:$16 sps:$4 sm:$0xff]  }
 0x351   :  { %2351 = vmatprep.subr.bf16.mxu1 %v3083_v2  ;;  %v3162_v2 = vld [vmem:[#allocation11 + $0x368] ss:$16 sps:$4 sm:$0xff]  }
 0x354   :  { %2352 = vmatpush2.bf16.msra.mxu1 %v3081_v3  ;;  %v3167_v3 = vld [vmem:[#allocation11 + $0x34c] ss:$16 sps:$4 sm:$0xff]  }
 0x355   :  { %2353 = vmatprep.subr.bf16.mxu1 %v3089_v4  ;;  %v3165_v4 = vld [vmem:[#allocation11 + $0x348] ss:$16 sps:$4 sm:$0xff]  }
 0x358   :  { %2354 = vmatpush2.bf16.msra.mxu1 %v3087_v5  ;;  %v3170_v5 = vld [vmem:[#allocation11 + $0x32c] ss:$16 sps:$4 sm:$0xff]  }
 0x359   :  { %2355 = vmatprep.subr.bf16.mxu1 %v3095_v6  ;;  %v3168_v6 = vld [vmem:[#allocation11 + $0x328] ss:$16 sps:$4 sm:$0xff]  }
 0x35c   :  { %2356 = vmatpush2.bf16.msra.mxu1 %v3093_v7  ;;  %v3173_v7 = vld [vmem:[#allocation11 + $0x30c] ss:$16 sps:$4 sm:$0xff]  }
 0x35d   :  { %2357 = vmatprep.subr.bf16.mxu1 %v3101_v8  ;;  %v3171_v8 = vld [vmem:[#allocation11 + $0x308] ss:$16 sps:$4 sm:$0xff]  }
 0x360   :  { %2358 = vmatpush2.bf16.msra.mxu1 %v3099_v9 }
 0x361   :  { %2359 = vmatprep.subr.bf16.mxu1 %v3107_v10 }
 0x364   :  { %2360 = vmatpush2.bf16.msra.mxu1 %v3105_v12 }
 0x365   :  { %2361 = vmatprep.subr.bf16.mxu1 %v3113_v13 }
 0x366   :  { %v1399_v18 = vpop.f32.mrf.mxu1  ;;  %v1440_v21 = vpop.f32.mrf.mxu0 }
 0x367   :  { %v1400_v22 = vadd.f32 %v1399_v18, %v634_v14  ;;  %v1591_v14 = vld [vmem:[%s3497_s9] sm:$0xf] }
 0x368   :  { %v1401_v23 = vpop.f32.mrf.mxu1  ;;  %v1442_v24 = vpop.f32.mrf.mxu0  ;;  %2362 = vmatpush2.bf16.msra.mxu1 %v3111_v15  ;;  %v1596_v15 = vrot.slane %v1591_v14, %v3430_v42 }
 0x369   :  { %v1441_v26 = vadd.f32 %v1440_v21, %v1400_v22  ;;  %v1402_v27 = vadd.f32 %v1401_v23, %v638_v16  ;;  %2363 = vmatprep.subr.bf16.mxu1 %v3119_v17  ;;  %v1600_v16 = vrot.slane %v1591_v14, %v3437_v49 }
 0x36a   :  { %v1403_v30 = vpop.f32.mrf.mxu1  ;;  %v1444_v31 = vpop.f32.mrf.mxu0 }
 0x36b   :  { %vm1449_vm11 = vcmp.gt.f32.partialorder %v1441_v26, 0.0  ;;  %v1453_v32 = vmul.f32 0.2, %v1441_v26  ;;  %v1443_v33 = vadd.f32 %v1442_v24, %v1402_v27  ;;  %v2429_v24 = vld [vmem:[%s3498_s10] sm:$0xf] }
 0x36c   :  { %v1404_v19 = vpop.f32.mrf.mxu1  ;;  %v1445_v20 = vpop.f32.mrf.mxu0  ;;  %2364 = vmatpush2.bf16.msra.mxu1 %v3117_v25  ;;  %v2434_v30 = vrot.slane %v2429_v24, %v3430_v42  ;;  %v2438_v31 = vrot.slane %v2429_v24, %v3437_v49 }
 0x36d   :  { %vm1450_vm12 = vcmp.gt.f32.partialorder %v1443_v33, 0.0  ;;  %v1454_v34 = vmul.f32 0.2, %v1443_v33  ;;  %2365 = vmatprep.subr.bf16.mxu1 %v3125_v28  ;;  %v1457_v35 = vsel %vm1449_vm11, %v1441_v26, %v1453_v32 }
 0x36e   :  { %v3466_v39 = vpack.c.bf16 %v1457_v35, %v1457_v35 }
 0x36f   :  { %v1458_v36 = vsel %vm1450_vm12, %v1443_v33, %v1454_v34 }
 0x370   :  { %2366 = vmatpush2.bf16.msra.mxu1 %v3123_v29  ;;  %v1462_v37 = vpack.c.bf16 %v1458_v36, %v1458_v36 }
 0x372   :  { %2326 = vmatprep.mubr.bf16.mxu0 %v1462_v37 }
 0x373   :  { %2327 = vmatmul.mubr.bf16.vlgmr.msra.gmra.mxu0 %v3466_v39  ;;  %2368 = vmatmul.mubr.bf16.vlgmr.msra.gmra.mxu1 %v3459_v51  ;;  %v3146_v51 = vld [vmem:[#allocation11 + $0x22c] ss:$16 sps:$4 sm:$0xff]  }
 0x374   :  { %2377 = vmatpush1.bf16.msra.mxu0 %v3126_v38  ;;  %2408 = vmatprep.mubr.bf16.mxu0 %v1462_v37 }
 0x375   :  { %2378 = vmatprep.subr.bf16.mxu0 %v3131_v40  ;;  %v1608_v40 = vrot.slane %v1591_v14, %v3439_v50 }
 0x378   :  { %2379 = vmatpush1.bf16.msra.mxu0 %v3129_v41 }
 0x379   :  { %2380 = vmatprep.subr.bf16.mxu0 %v3134_v44 }
 0x37c   :  { %2381 = vmatpush1.bf16.msra.mxu0 %v3132_v45 }
 0x37d   :  { %2382 = vmatprep.subr.bf16.mxu0 %v3137_v46  ;;  %v2442_v46 = vrot.slane %v2429_v24, %v3432_v43 }
 0x380   :  { %2383 = vmatpush1.bf16.msra.mxu0 %v3135_v47 }
 0x381   :  { %2384 = vmatprep.subr.bf16.mxu0 %v3140_v48 }
 0x384   :  { %2385 = vmatpush1.bf16.msra.mxu0 %v3138_v11 }
 0x385   :  { %2386 = vmatprep.subr.bf16.mxu0 %v3143_v52  ;;  %v2446_v52 = vrot.slane %v2429_v24, %v3439_v50 }
 0x388   :  { %2387 = vmatpush1.bf16.msra.mxu0 %v3141_v53 }
 0x389   :  { %2388 = vmatprep.subr.bf16.mxu0 %v3146_v51 }
 0x38c   :  { %2389 = vmatpush1.bf16.msra.mxu0 %v3144_v54 }
 0x38d   :  { %2390 = vmatprep.subr.bf16.mxu0 %v3149_v55 }
 0x390   :  { %2391 = vmatpush1.bf16.msra.mxu0 %v3147_v56 }
 0x391   :  { %2392 = vmatprep.subr.bf16.mxu0 %v3152_v57 }
 0x394   :  { %2393 = vmatpush2.bf16.msra.mxu0 %v3150_v58 }
 0x395   :  { %2394 = vmatprep.subr.bf16.mxu0 %v3155_v59 }
 0x398   :  { %2395 = vmatpush2.bf16.msra.mxu0 %v3153_v60  ;;  %v2756_v60 = vld [vmem:[#allocation2] ss:$0 sm:$0xff] }
 0x399   :  { %2396 = vmatprep.subr.bf16.mxu0 %v3158_v61 }
 0x39c   :  { %2397 = vmatpush2.bf16.msra.mxu0 %v3156_v62 }
 0x39d   :  { %2398 = vmatprep.subr.bf16.mxu0 %v3161_v63 }
 0x3a0   :  { %2399 = vmatpush2.bf16.msra.mxu0 %v3159_v0 }
 0x3a1   :  { %2400 = vmatprep.subr.bf16.mxu0 %v3164_v1 }
 0x3a4   :  { %2401 = vmatpush2.bf16.msra.mxu0 %v3162_v2 }
 0x3a5   :  { %2402 = vmatprep.subr.bf16.mxu0 %v3167_v3 }
 0x3a8   :  { %2403 = vmatpush2.bf16.msra.mxu0 %v3165_v4 }
 0x3a9   :  { %2404 = vmatprep.subr.bf16.mxu0 %v3170_v5 }
 0x3ac   :  { %2405 = vmatpush2.bf16.msra.mxu0 %v3168_v6 }
 0x3ad   :  { %2406 = vmatprep.subr.bf16.mxu0 %v3173_v7 }
 0x3b0   :  { %2407 = vmatpush2.bf16.msra.mxu0 %v3171_v8 }
 0x3b3   :  { %2409 = vmatmul.mubr.bf16.vlgmr.msra.gmra.mxu0 %v3466_v39  ;;  %v1604_v39 = vrot.slane %v1591_v14, %v3432_v43 }
 0x3f3   :  { %v2287_v9 = vpop.f32.mrf.mxu1 }
 0x3f4   :  { %v2288_v17 = vadd.f32 %v2287_v9, %v1596_v15 }
 0x3f5   :  { %v2289_v10 = vpop.f32.mrf.mxu1 }
 0x3f6   :  { %v2290_v22 = vadd.f32 %v2289_v10, %v1600_v16 }
 0x3f7   :  { %v2291_v12 = vpop.f32.mrf.mxu1 }
 0x3f9   :  { %v2292_v13 = vpop.f32.mrf.mxu1 }
 0x433   :  { %v2328_v18 = vpop.f32.mrf.mxu0  ;;  %v2369_v21 = vpop.f32.mrf.mxu1 }
 0x434   :  { %v2329_v23 = vadd.f32 %v2328_v18, %v2288_v17  ;;  %v2370_v41 = vadd.f32 %v2369_v21, %v1604_v39 }
 0x435   :  { %v2330_v25 = vpop.f32.mrf.mxu0  ;;  %v2371_v26 = vpop.f32.mrf.mxu1 }
 0x436   :  { %vm2417_vm13 = vcmp.gt.f32.partialorder %v2329_v23, 0.0  ;;  %v2421_v27 = vmul.f32 0.2, %v2329_v23  ;;  %v2331_v28 = vadd.f32 %v2330_v25, %v2290_v22  ;;  %v2372_v42 = vadd.f32 %v2371_v26, %v1608_v40 }
 0x437   :  { %v2332_v32 = vpop.f32.mrf.mxu0  ;;  %v2373_v33 = vpop.f32.mrf.mxu1 }
 0x438   :  { %v2425_v19 = vsel %vm2417_vm13, %v2329_v23, %v2421_v27  ;;  %vm2418_vm14 = vcmp.gt.f32.partialorder %v2331_v28, 0.0  ;;  %v2422_v20 = vmul.f32 0.2, %v2331_v28 }
 0x439   :  { %v2333_v29 = vpop.f32.mrf.mxu0  ;;  %v2374_v34 = vpop.f32.mrf.mxu1  ;;  %v2451_v36 = vmul.f32 %v2434_v30, %v2425_v19 }
 0x43a   :  { %v2426_v35 = vsel %vm2418_vm14, %v2331_v28, %v2422_v20 }
 0x43b   :  { %v2452_v37 = vmul.f32 %v2438_v31, %v2426_v35 }
 0x43d   :  { %v2455_v38 = vadd.f32 %v2452_v37, %v2451_v36 }
 0x473   :  { %v2410_v44 = vpop.f32.mrf.mxu0 }
 0x474   :  { %v2411_v45 = vadd.f32 %v2410_v44, %v2370_v41 }
 0x475   :  { %v2412_v49 = vpop.f32.mrf.mxu0 }
 0x476   :  { %vm2419_vm15 = vcmp.gt.f32.partialorder %v2411_v45, 0.0  ;;  %v2423_v47 = vmul.f32 0.2, %v2411_v45  ;;  %v2413_v48 = vadd.f32 %v2412_v49, %v2372_v42 }
 0x477   :  { %v2414_v11 = vpop.f32.mrf.mxu0 }
 0x478   :  { %v2427_v53 = vsel %vm2419_vm15, %v2411_v45, %v2423_v47  ;;  %vm2420_vm0 = vcmp.gt.f32.partialorder %v2413_v48, 0.0  ;;  %v2424_v51 = vmul.f32 0.2, %v2413_v48 }
 0x479   :  { %v2415_v54 = vpop.f32.mrf.mxu0  ;;  %v2453_v55 = vmul.f32 %v2442_v46, %v2427_v53 }
 0x47a   :  { %v2428_v56 = vsel %vm2420_vm0, %v2413_v48, %v2424_v51 }
 0x47b   :  { %v2454_v57 = vmul.f32 %v2446_v52, %v2428_v56  ;;  %v2456_v58 = vadd.f32 %v2455_v38, %v2453_v55 }
 0x47d   :  { %v2457_v59 = vadd.f32 %v2456_v58, %v2454_v57 }
 0x47f   :  { %2458 = vadd.xlane.f32.xlu0 %v2457_v59 }
 0x508   :  { %v2459_v61 = vpop.xlane.xlu0 %2458 }
 0x509   :  { %v2467_v43 = vadd.f32 %v2756_v60, %v2459_v61 }
 0x50b   :  { %2469 = vst.msk [vmem:[%s3500_s12] sm:$0xff] %vm2468_vm1, %v2467_v43 }
 0x50c   :  { %2474 = vsyncpa [#allocation4], 1 }
 0x50d   :  { %2475 = vsyncpa [#allocation6], 1 }
 0x50e   :  { %2476 = vsyncpa [#allocation9], 1 }
 0x50f   :  { %2477 = vsyncpa [#allocation12], 1 }

</bundles_post_ra>
